<compile_context>
chip_gen: v5e
topology: v5e:2x2
jax: 0.10.0
libtpu: 0.0.40
codegen_flags: <defaults>
</compile_context>

<pallas_src>
import math
import functools

import jax
import jax.numpy as jnp
from jax.experimental import pallas as pl
from jax.experimental.pallas import tpu as pltpu


LAYER_KEYS = ("ln1_g", "ln1_b", "qkv_w", "qkv_b", "out_w", "out_b",
              "ln2_g", "ln2_b", "ff1_w", "ff1_b", "ff2_w", "ff2_b")


def _layer_norm(v, g, b, eps=1e-5):
    mu = jnp.mean(v, axis=-1, keepdims=True)
    var = jnp.mean(jnp.square(v - mu), axis=-1, keepdims=True)
    return (v - mu) * jax.lax.rsqrt(var + eps) * g + b


# -----------------------------------------------------------------------------
# Fused encoder kernel: grid = (batch_tiles, num_layers)
# -----------------------------------------------------------------------------
def encoder_kernel(
    x_ref, mask_bias_ref, mask_col_ref,
    ln1_g_ref, ln1_b_ref, qkv_w_ref, qkv_b_ref,
    out_w_ref, out_b_ref, ln2_g_ref, ln2_b_ref,
    ff1_w_ref, ff1_b_ref, ff2_w_ref, ff2_b_ref,
    fc_w_ref, fc_b_ref,
    o_ref,
    x_act,                       # VMEM scratch: resident (bt, T, D) activation
    *, num_heads,
):
    layer = pl.program_id(1)
    num_layers = pl.num_programs(1)

    # Load the embedded + positionally-encoded activation once per batch tile;
    # it stays resident in VMEM across all layers.
    @pl.when(layer == 0)
    def _():
        x_act[...] = x_ref[...]

    bt, T, D = x_act.shape
    H = num_heads
    hd = D // H
    R = bt * T
    bf16 = jnp.bfloat16

    x = x_act[...]                                   # (bt, T, D) f32

    # ---- pre-LN multi-head self-attention ----------------------------------
    # 1/sqrt(hd) is pre-folded into the Q columns of qkv_w / qkv_b (wrapper).
    h1 = _layer_norm(x, ln1_g_ref[0], ln1_b_ref[0])
    qkv = (jnp.dot(h1.reshape(R, D).astype(bf16), qkv_w_ref[0],
                   preferred_element_type=jnp.float32)
           + qkv_b_ref[0]).reshape(bt, T, 3 * D)

    q_all = qkv[..., :D]
    k_all = qkv[..., D:2 * D]
    v_all = qkv[..., 2 * D:]
    # additive key-padding bias, computed once, shared by all heads/queries
    bias = (mask_bias_ref[...] - 1.0) * 1e30         # (bt, 1, T)

    # TODO(synk): a single 'bqhd,bkhd->bhqk' contraction (two batch dims) is
    # not reliably lowered by Mosaic dot_general (single leading batch dim
    # only), so heads stay a small static unroll of 3-D einsums.
    head_ctx = []
    for h in range(H):
        sl = slice(h * hd, (h + 1) * hd)
        qh = q_all[..., sl].astype(bf16)             # (bt, T, hd)
        kh = k_all[..., sl].astype(bf16)
        vh = v_all[..., sl].astype(bf16)
        s = jnp.einsum("bqd,bkd->bqk", qh, kh,
                       preferred_element_type=jnp.float32) + bias
        s = s - jnp.max(s, axis=-1, keepdims=True)
        p = jnp.exp(s)                               # f32 softmax
        p = p * pl.reciprocal(jnp.sum(p, axis=-1, keepdims=True), approx=True)
        head_ctx.append(jnp.einsum("bqk,bkd->bqd", p.astype(bf16), vh,
                                   preferred_element_type=jnp.float32))
    ctx = jnp.concatenate(head_ctx, axis=-1)         # (bt, T, D)

    attn = (jnp.dot(ctx.reshape(R, D).astype(bf16), out_w_ref[0],
                    preferred_element_type=jnp.float32)
            + out_b_ref[0]).reshape(bt, T, D)
    x = x + attn                                     # residual 1

    # ---- pre-LN feed-forward ------------------------------------------------
    h2 = _layer_norm(x, ln2_g_ref[0], ln2_b_ref[0]).reshape(R, D)
    f1 = jnp.maximum(
        jnp.dot(h2.astype(bf16), ff1_w_ref[0],
                preferred_element_type=jnp.float32) + ff1_b_ref[0],
        0.0).astype(bf16)                            # bf16 intermediate (review)
    f2 = (jnp.dot(f1, ff2_w_ref[0], preferred_element_type=jnp.float32)
          + ff2_b_ref[0]).reshape(bt, T, D)
    x = x + f2                                       # residual 2
    x_act[...] = x

    # ---- fused epilogue on the last layer: pool + fc + L2 normalize ---------
    @pl.when(layer == num_layers - 1)
    def _():
        mcol = mask_col_ref[...]                     # (bt, T, 1)
        xm = x * mcol                                # reuse live x (no re-read)
        summed = jnp.sum(xm, axis=1)                 # (bt, D)
        counts = jnp.maximum(jnp.sum(mcol, axis=1), 1.0)   # (bt, 1)
        pooled = summed / counts
        out = (jnp.dot(pooled.astype(bf16), fc_w_ref[...],
                       preferred_element_type=jnp.float32) + fc_b_ref[...])
        norm = jnp.sqrt(jnp.sum(out * out, axis=1, keepdims=True))
        o_ref[...] = out / jnp.maximum(norm, 1e-12)  # F.normalize(p=2)


# -----------------------------------------------------------------------------
# VMEM budget (review: set vmem_limit_bytes explicitly, sized from footprint)
# -----------------------------------------------------------------------------
def _vmem_budget_bytes(bt, T, D, layer_arrays, fc_w, fc_b):
    f32, bf = 4, 2
    need = 0
    need += 2 * bt * T * D * f32                     # x block (double-buffered)
    need += 2 * bt * T * f32 * 2                     # two mask blocks
    for a in layer_arrays:                           # per-layer weight blocks (x2 buf)
        need += 2 * (a.size // a.shape[0]) * a.dtype.itemsize
    need += 2 * (fc_w.size * fc_w.dtype.itemsize + fc_b.size * fc_b.dtype.itemsize)
    need += 2 * bt * D * f32                         # output block
    need += bt * T * D * f32                         # x_act scratch
    # live in-layer temporaries: qkv, scores/probs, ffn intermediate, residual
    need += bt * T * 3 * D * f32
    need += 2 * bt * T * T * f32
    need += bt * T * 4 * D * bf
    need += 2 * bt * T * D * f32
    need = int(need * 1.25)                          # compiler-temporary headroom
    # Default scoped VMEM is 16 MiB (v5e) / 32 MiB (v6e/v7x); cap at 64 MiB so
    # the limit never exceeds physical VMEM on any generation (v7x = 64 MiB;
    # v5e/v6e have 128 MiB and can be raised further if needed).
    return min(max(need, 32 << 20), 64 << 20)


# -----------------------------------------------------------------------------
# Wrapper: embedding/PE glue + one fused pallas_call over (batch_tiles, layers)
# -----------------------------------------------------------------------------
def transformer_text_encoder(captions, params, num_heads, *, batch_tile=None):
    B, T = captions.shape
    D = params["embedding"].shape[1]
    L = params["qkv_w"].shape[0]
    hd = D // num_heads

    # glue: embedding lookup + positional encoding.
    # TODO(synk): the data-dependent embedding gather stays in plain JAX; an
    # in-kernel version would need a manual DMA gather over the vocab table.
    x = (jnp.take(params["embedding"], captions, axis=0)
         + params["pe"][None, :T, :]).astype(jnp.float32)         # (B, T, D)
    mask_f = (captions != 0).astype(jnp.float32)                  # (B, T)
    mask_bias = mask_f[:, None, :]                                # (B, 1, T)
    mask_col = mask_f[:, :, None]                                 # (B, T, 1)

    # Fold 1/sqrt(hd) into the Q third of the QKV projection (one-time, free).
    scale = 1.0 / math.sqrt(hd)
    qkv_w = params["qkv_w"]
    qkv_w = jnp.concatenate(
        [(qkv_w[..., :D].astype(jnp.float32) * scale).astype(qkv_w.dtype),
         qkv_w[..., D:]], axis=-1)
    qkv_b = params["qkv_b"].at[..., :D].multiply(scale)
    prm = dict(params, qkv_w=qkv_w, qkv_b=qkv_b)

    bt = B if batch_tile is None else batch_tile
    assert B % bt == 0 and (bt == B or bt % 8 == 0)

    layer_inputs = tuple(prm[k] for k in LAYER_KEYS)

    def per_layer_spec(arr):
        nd = arr.ndim
        return pl.BlockSpec((1,) + arr.shape[1:],
                            lambda b, l, _nd=nd: (l,) + (0,) * (_nd - 1))

    in_specs = (
        [pl.BlockSpec((bt, T, D), lambda b, l: (b, 0, 0)),   # x (cached over l)
         pl.BlockSpec((bt, 1, T), lambda b, l: (b, 0, 0)),   # mask (key bias layout)
         pl.BlockSpec((bt, T, 1), lambda b, l: (b, 0, 0))]   # mask (pool layout)
        + [per_layer_spec(a) for a in layer_inputs]          # per-layer weights
        + [pl.BlockSpec((D, D), lambda b, l: (0, 0)),        # fc_w
           pl.BlockSpec((1, D), lambda b, l: (0, 0))]        # fc_b
    )

    grid_spec = pltpu.PrefetchScalarGridSpec(
        num_scalar_prefetch=0,
        grid=(B // bt, L),
        in_specs=in_specs,
        out_specs=pl.BlockSpec((bt, D), lambda b, l: (b, 0)),
        scratch_shapes=[pltpu.VMEM((bt, T, D), jnp.float32)],
    )

    vmem_limit = _vmem_budget_bytes(bt, T, D, layer_inputs,
                                    prm["fc_w"], prm["fc_b"])

    return pl.pallas_call(
        functools.partial(encoder_kernel, num_heads=num_heads),
        out_shape=jax.ShapeDtypeStruct((B, D), jnp.float32),
        grid_spec=grid_spec,
        compiler_params=pltpu.CompilerParams(
            dimension_semantics=("parallel", "arbitrary"),
            vmem_limit_bytes=vmem_limit),
    )(x, mask_bias, mask_col, *layer_inputs, prm["fc_w"], prm["fc_b"])


# -----------------------------------------------------------------------------
# Pure-JAX reference (mirrors the PyTorch module) for a correctness check
# -----------------------------------------------------------------------------
def reference_forward(captions, params, num_heads):
    B, T = captions.shape
    D = params["embedding"].shape[1]
    H, hd = num_heads, D // num_heads
    L = params["qkv_w"].shape[0]
    f32 = jnp.float32

    x = jnp.take(params["embedding"], captions, axis=0) + params["pe"][None, :T]
    mask = captions != 0
    for l in range(L):
        h1 = _layer_norm(x, params["ln1_g"][l], params["ln1_b"][l])
        qkv = h1 @ params["qkv_w"][l].astype(f32) + params["qkv_b"][l, 0]
        q, k, v = qkv[..., :D], qkv[..., D:2 * D], qkv[..., 2 * D:]
        q = q.reshape(B, T, H, hd).transpose(0, 2, 1, 3)
        k = k.reshape(B, T, H, hd).transpose(0, 2, 1, 3)
        v = v.reshape(B, T, H, hd).transpose(0, 2, 1, 3)
        s = (q @ jnp.swapaxes(k, -1, -2)) / math.sqrt(hd)
        s = jnp.where(mask[:, None, None, :], s, -jnp.inf)
        p = jax.nn.softmax(s, axis=-1)
        ctx = (p @ v).transpose(0, 2, 1, 3).reshape(B, T, D)
        x = x + ctx @ params["out_w"][l].astype(f32) + params["out_b"][l, 0]
        h2 = _layer_norm(x, params["ln2_g"][l], params["ln2_b"][l])
        f = jnp.maximum(h2 @ params["ff1_w"][l].astype(f32)
                        + params["ff1_b"][l, 0], 0.0)
        x = x + f @ params["ff2_w"][l].astype(f32) + params["ff2_b"][l, 0]
    mf = mask.astype(f32)[..., None]
    pooled = (x * mf).sum(1) / jnp.maximum(mf.sum(1), 1.0)
    out = pooled @ params["fc_w"].astype(f32) + params["fc_b"][0]
    n = jnp.sqrt(jnp.sum(out * out, axis=1, keepdims=True))
    return out / jnp.maximum(n, 1e-12)


# -----------------------------------------------------------------------------
# Parameter init (deterministic, synthetic)
# -----------------------------------------------------------------------------
def positional_encoding(max_len, d_model):
    pos = jnp.arange(max_len, dtype=jnp.float32)[:, None]
    div = jnp.exp(jnp.arange(0, d_model, 2, dtype=jnp.float32)
                  * (-math.log(10000.0) / d_model))
    pe = jnp.zeros((max_len, d_model), jnp.float32)
    pe = pe.at[:, 0::2].set(jnp.sin(pos * div))
    pe = pe.at[:, 1::2].set(jnp.cos(pos * div))
    return pe


def init_params(key, vocab_size, embed_dim, num_layers, max_len):
    D, L = embed_dim, num_layers
    k_emb, k_fc, k_qkv, k_out, k_ff1, k_ff2 = jax.random.split(key, 6)
    emb = jax.random.normal(k_emb, (vocab_size, D), jnp.float32) * 0.02
    emb = emb.at[0].set(0.0)                            # padding_idx = 0 row
    bf = jnp.bfloat16
    return {
        "embedding": emb,
        "pe": positional_encoding(max_len, D),
        # matmul weights stored bf16 (half the HBM/VMEM traffic, f32 accum)
        "fc_w": (jax.random.normal(k_fc, (D, D), jnp.float32) * 0.02).astype(bf),
        "fc_b": jnp.zeros((1, D), jnp.float32),
        "ln1_g": jnp.ones((L, 1, D), jnp.float32),
        "ln1_b": jnp.zeros((L, 1, D), jnp.float32),
        "qkv_w": (jax.random.normal(k_qkv, (L, D, 3 * D), jnp.float32) * 0.02).astype(bf),
        "qkv_b": jnp.zeros((L, 1, 3 * D), jnp.float32),
        "out_w": (jax.random.normal(k_out, (L, D, D), jnp.float32) * 0.02).astype(bf),
        "out_b": jnp.zeros((L, 1, D), jnp.float32),
        "ln2_g": jnp.ones((L, 1, D), jnp.float32),
        "ln2_b": jnp.zeros((L, 1, D), jnp.float32),
        "ff1_w": (jax.random.normal(k_ff1, (L, D, 4 * D), jnp.float32) * 0.02).astype(bf),
        "ff1_b": jnp.zeros((L, 1, 4 * D), jnp.float32),
        "ff2_w": (jax.random.normal(k_ff2, (L, 4 * D, D), jnp.float32) * 0.02).astype(bf),
        "ff2_b": jnp.zeros((L, 1, D), jnp.float32),
    }


if __name__ == "__main__":
    # Toy shapes for a functional check only (review: tune at D>=256, T>=128).
    VOCAB, D, HEADS, LAYERS, MAX_LEN = 32, 32, 4, 2, 100
    B, T = 2, 8

    key = jax.random.PRNGKey(0)
    pkey, ckey = jax.random.split(key)
    params = init_params(pkey, VOCAB, D, LAYERS, MAX_LEN)

    captions = jax.random.randint(ckey, (B, T), 1, VOCAB, dtype=jnp.int32)
    captions = captions.at[0, 6:].set(0)   # padding tokens (padding_idx=0)
    captions = captions.at[1, 5:].set(0)

    fwd = jax.jit(functools.partial(transformer_text_encoder, num_heads=HEADS))
    out = jax.block_until_ready(fwd(captions, params))
    assert out.shape == (B, D)
    assert bool(jnp.all(jnp.isfinite(out)))

    # Loose tolerance: bf16 matmul operands + approx softmax reciprocal.
    ref = reference_forward(captions, params, HEADS)
    err = float(jnp.max(jnp.abs(out - ref)))
    assert err < 5e-2, f"max abs err vs reference: {err}"
    print("KERNEL_OK")
</pallas_src>

<mosaic_0001>
module attributes {stable_mosaic.version = 11 : i64} {
  func.func @encoder_kernel(%arg0: i32, %arg1: i32, %arg2: memref<2x8x32xf32, #tpu.memory_space<vmem>>, %arg3: memref<2x1x8xf32, #tpu.memory_space<vmem>>, %arg4: memref<2x8x1xf32, #tpu.memory_space<vmem>>, %arg5: memref<1x1x32xf32, #tpu.memory_space<vmem>>, %arg6: memref<1x1x32xf32, #tpu.memory_space<vmem>>, %arg7: memref<1x32x96xbf16, #tpu.memory_space<vmem>>, %arg8: memref<1x1x96xf32, #tpu.memory_space<vmem>>, %arg9: memref<1x32x32xbf16, #tpu.memory_space<vmem>>, %arg10: memref<1x1x32xf32, #tpu.memory_space<vmem>>, %arg11: memref<1x1x32xf32, #tpu.memory_space<vmem>>, %arg12: memref<1x1x32xf32, #tpu.memory_space<vmem>>, %arg13: memref<1x32x128xbf16, #tpu.memory_space<vmem>>, %arg14: memref<1x1x128xf32, #tpu.memory_space<vmem>>, %arg15: memref<1x128x32xbf16, #tpu.memory_space<vmem>>, %arg16: memref<1x1x32xf32, #tpu.memory_space<vmem>>, %arg17: memref<32x32xbf16, #tpu.memory_space<vmem>>, %arg18: memref<1x32xf32, #tpu.memory_space<vmem>>, %arg19: memref<2x32xf32, #tpu.memory_space<vmem>>, %arg20: memref<2x8x32xf32, #tpu.memory_space<vmem>>) attributes {dimension_semantics = [#tpu.dimension_semantics<parallel>, #tpu.dimension_semantics<arbitrary>], iteration_bounds = array<i64: 1, 2>, scalar_prefetch = 0 : i64, scratch_operands = 1 : i64, tpu.core_type = #tpu.core_type<tc>, window_params = [{transform_indices = @transform_0, window_bounds = array<i64: 2, 8, 32>}, {transform_indices = @transform_1, window_bounds = array<i64: 2, 1, 8>}, {transform_indices = @transform_2, window_bounds = array<i64: 2, 8, 1>}, {transform_indices = @transform_3, window_bounds = array<i64: 1, 1, 32>}, {transform_indices = @transform_4, window_bounds = array<i64: 1, 1, 32>}, {transform_indices = @transform_5, window_bounds = array<i64: 1, 32, 96>}, {transform_indices = @transform_6, window_bounds = array<i64: 1, 1, 96>}, {transform_indices = @transform_7, window_bounds = array<i64: 1, 32, 32>}, {transform_indices = @transform_8, window_bounds = array<i64: 1, 1, 32>}, {transform_indices = @transform_9, window_bounds = array<i64: 1, 1, 32>}, {transform_indices = @transform_10, window_bounds = array<i64: 1, 1, 32>}, {transform_indices = @transform_11, window_bounds = array<i64: 1, 32, 128>}, {transform_indices = @transform_12, window_bounds = array<i64: 1, 1, 128>}, {transform_indices = @transform_13, window_bounds = array<i64: 1, 128, 32>}, {transform_indices = @transform_14, window_bounds = array<i64: 1, 1, 32>}, {pipeline_mode = #tpu.pipeline_mode<synchronous>, transform_indices = @transform_15, window_bounds = array<i64: 32, 32>}, {pipeline_mode = #tpu.pipeline_mode<synchronous>, transform_indices = @transform_16, window_bounds = array<i64: 1, 32>}, {transform_indices = @transform_17, window_bounds = array<i64: 2, 32>}]} {
    %c0_i32 = arith.constant 0 : i32
    %0 = arith.cmpi eq, %arg1, %c0_i32 : i32
    %1 = arith.extui %0 : i1 to i32
    %c0_i32_0 = arith.constant 0 : i32
    %2 = arith.cmpi ne, %1, %c0_i32_0 : i32
    scf.if %2 {
      %c0_78 = arith.constant 0 : index
      %c0_79 = arith.constant 0 : index
      %c0_80 = arith.constant 0 : index
      %199 = vector.load %arg2[%c0_78, %c0_79, %c0_80] : memref<2x8x32xf32, #tpu.memory_space<vmem>>, vector<2x8x32xf32>
      %c0_81 = arith.constant 0 : index
      %c0_82 = arith.constant 0 : index
      %c0_83 = arith.constant 0 : index
      %200 = vector.load %arg20[%c0_81, %c0_82, %c0_83] : memref<2x8x32xf32, #tpu.memory_space<vmem>>, vector<2x8x32xf32>
      tpu.vector_store %arg20[%c0_81, %c0_82, %c0_83], %199 {strides = array<i32>} : memref<2x8x32xf32, #tpu.memory_space<vmem>>, vector<2x8x32xf32>,
    } else {
    }
    %c0 = arith.constant 0 : index
    %c0_1 = arith.constant 0 : index
    %c0_2 = arith.constant 0 : index
    %3 = vector.load %arg20[%c0, %c0_1, %c0_2] : memref<2x8x32xf32, #tpu.memory_space<vmem>>, vector<2x8x32xf32>
    %c0_3 = arith.constant 0 : index
    %c0_4 = arith.constant 0 : index
    %c0_5 = arith.constant 0 : index
    %4 = vector.load %arg5[%c0_3, %c0_4, %c0_5] : memref<1x1x32xf32, #tpu.memory_space<vmem>>, vector<1x1x32xf32>
    %5 = vector.shape_cast %4 : vector<1x1x32xf32> to vector<1x32xf32>
    %c0_6 = arith.constant 0 : index
    %c0_7 = arith.constant 0 : index
    %c0_8 = arith.constant 0 : index
    %6 = vector.load %arg6[%c0_6, %c0_7, %c0_8] : memref<1x1x32xf32, #tpu.memory_space<vmem>>, vector<1x1x32xf32>
    %7 = vector.shape_cast %6 : vector<1x1x32xf32> to vector<1x32xf32>
    %cst = arith.constant dense<0.000000e+00> : vector<2x8xf32>
    %8 = vector.multi_reduction <add>, %3, %cst [2] : vector<2x8x32xf32> to vector<2x8xf32>
    %9 = vector.shape_cast %8 : vector<2x8xf32> to vector<2x8x1xf32>
    %cst_9 = arith.constant 3.200000e+01 : f32
    %10 = vector.broadcast %cst_9 : f32 to vector<2x8x1xf32>
    %11 = arith.divf %9, %10 : vector<2x8x1xf32>
    %12 = vector.broadcast %11 : vector<2x8x1xf32> to vector<2x8x32xf32>
    %13 = arith.subf %3, %12 : vector<2x8x32xf32>
    %14 = arith.mulf %13, %13 : vector<2x8x32xf32>
    %cst_10 = arith.constant dense<0.000000e+00> : vector<2x8xf32>
    %15 = vector.multi_reduction <add>, %14, %cst_10 [2] : vector<2x8x32xf32> to vector<2x8xf32>
    %16 = vector.shape_cast %15 : vector<2x8xf32> to vector<2x8x1xf32>
    %cst_11 = arith.constant 3.200000e+01 : f32
    %17 = vector.broadcast %cst_11 : f32 to vector<2x8x1xf32>
    %18 = arith.divf %16, %17 : vector<2x8x1xf32>
    %19 = vector.broadcast %11 : vector<2x8x1xf32> to vector<2x8x32xf32>
    %20 = arith.subf %3, %19 : vector<2x8x32xf32>
    %cst_12 = arith.constant 9.99999974E-6 : f32
    %21 = vector.broadcast %cst_12 : f32 to vector<2x8x1xf32>
    %22 = arith.addf %18, %21 : vector<2x8x1xf32>
    %23 = math.rsqrt %22 : vector<2x8x1xf32>
    %24 = vector.broadcast %23 : vector<2x8x1xf32> to vector<2x8x32xf32>
    %25 = arith.mulf %20, %24 : vector<2x8x32xf32>
    %26 = vector.shape_cast %5 : vector<1x32xf32> to vector<1x1x32xf32>
    %27 = vector.broadcast %26 : vector<1x1x32xf32> to vector<2x8x32xf32>
    %28 = arith.mulf %25, %27 : vector<2x8x32xf32>
    %29 = vector.shape_cast %7 : vector<1x32xf32> to vector<1x1x32xf32>
    %30 = vector.broadcast %29 : vector<1x1x32xf32> to vector<2x8x32xf32>
    %31 = arith.addf %28, %30 : vector<2x8x32xf32>
    %32 = vector.shape_cast %31 : vector<2x8x32xf32> to vector<16x32xf32>
    %33 = arith.truncf %32 : vector<16x32xf32> to vector<16x32xbf16>
    %c0_13 = arith.constant 0 : index
    %c0_14 = arith.constant 0 : index
    %c0_15 = arith.constant 0 : index
    %34 = vector.load %arg7[%c0_13, %c0_14, %c0_15] : memref<1x32x96xbf16, #tpu.memory_space<vmem>>, vector<1x32x96xbf16>
    %35 = vector.shape_cast %34 : vector<1x32x96xbf16> to vector<32x96xbf16>
    %cst_16 = arith.constant dense<0.000000e+00> : vector<16x96xf32>
    %36 = tpu.matmul %33, %35, %cst_16 {dimension_numbers = #tpu.dot_dimension_numbers<[1], [0], [0], [1], [0, 0, 1, 1], [], []>} : vector<16x32xbf16>, vector<32x96xbf16>, vector<16x96xf32> -> vector<16x96xf32>
    %c0_17 = arith.constant 0 : index
    %c0_18 = arith.constant 0 : index
    %c0_19 = arith.constant 0 : index
    %37 = vector.load %arg8[%c0_17, %c0_18, %c0_19] : memref<1x1x96xf32, #tpu.memory_space<vmem>>, vector<1x1x96xf32>
    %38 = vector.shape_cast %37 : vector<1x1x96xf32> to vector<1x96xf32>
    %39 = vector.broadcast %38 : vector<1x96xf32> to vector<16x96xf32>
    %40 = arith.addf %36, %39 : vector<16x96xf32>
    %41 = vector.shape_cast %40 : vector<16x96xf32> to vector<2x8x96xf32>
    %42 = vector.extract_strided_slice %41 {offsets = [0, 0, 0], sizes = [2, 8, 32], strides = [1, 1, 1]} : vector<2x8x96xf32> to vector<2x8x32xf32>
    %43 = vector.extract_strided_slice %41 {offsets = [0, 0, 32], sizes = [2, 8, 32], strides = [1, 1, 1]} : vector<2x8x96xf32> to vector<2x8x32xf32>
    %44 = vector.extract_strided_slice %41 {offsets = [0, 0, 64], sizes = [2, 8, 32], strides = [1, 1, 1]} : vector<2x8x96xf32> to vector<2x8x32xf32>
    %c0_20 = arith.constant 0 : index
    %c0_21 = arith.constant 0 : index
    %c0_22 = arith.constant 0 : index
    %45 = vector.load %arg3[%c0_20, %c0_21, %c0_22] : memref<2x1x8xf32, #tpu.memory_space<vmem>>, vector<2x1x8xf32>
    %cst_23 = arith.constant 1.000000e+00 : f32
    %46 = vector.broadcast %cst_23 : f32 to vector<2x1x8xf32>
    %47 = arith.subf %45, %46 : vector<2x1x8xf32>
    %cst_24 = arith.constant 1.000000e+30 : f32
    %48 = vector.broadcast %cst_24 : f32 to vector<2x1x8xf32>
    %49 = arith.mulf %47, %48 : vector<2x1x8xf32>
    %50 = vector.extract_strided_slice %42 {offsets = [0, 0, 0], sizes = [2, 8, 8], strides = [1, 1, 1]} : vector<2x8x32xf32> to vector<2x8x8xf32>
    %51 = arith.truncf %50 : vector<2x8x8xf32> to vector<2x8x8xbf16>
    %52 = vector.extract_strided_slice %43 {offsets = [0, 0, 0], sizes = [2, 8, 8], strides = [1, 1, 1]} : vector<2x8x32xf32> to vector<2x8x8xf32>
    %53 = arith.truncf %52 : vector<2x8x8xf32> to vector<2x8x8xbf16>
    %54 = vector.extract_strided_slice %44 {offsets = [0, 0, 0], sizes = [2, 8, 8], strides = [1, 1, 1]} : vector<2x8x32xf32> to vector<2x8x8xf32>
    %55 = arith.truncf %54 : vector<2x8x8xf32> to vector<2x8x8xbf16>
    "tpu.trace_start"() <{level = 10 : i32, message = "bqd,bkd->bqk"}> : () -> ()
    %cst_25 = arith.constant dense<0.000000e+00> : vector<2x8x8xf32>
    %56 = tpu.matmul %51, %53, %cst_25 {dimension_numbers = #tpu.dot_dimension_numbers<[2], [2], [1], [1], [0, 0, 0, 1, 1, 1], [0], [0]>} : vector<2x8x8xbf16>, vector<2x8x8xbf16>, vector<2x8x8xf32> -> vector<2x8x8xf32>
    "tpu.trace_stop"() : () -> ()
    %57 = vector.broadcast %49 : vector<2x1x8xf32> to vector<2x8x8xf32>
    %58 = arith.addf %56, %57 : vector<2x8x8xf32>
    %cst_26 = arith.constant dense<0xFF800000> : vector<2x8xf32>
    %59 = vector.multi_reduction <maximumf>, %58, %cst_26 [2] : vector<2x8x8xf32> to vector<2x8xf32>
    %60 = vector.shape_cast %59 : vector<2x8xf32> to vector<2x8x1xf32>
    %61 = vector.broadcast %60 : vector<2x8x1xf32> to vector<2x8x8xf32>
    %62 = arith.subf %58, %61 : vector<2x8x8xf32>
    %63 = math.exp %62 : vector<2x8x8xf32>
    %cst_27 = arith.constant dense<0.000000e+00> : vector<2x8xf32>
    %64 = vector.multi_reduction <add>, %63, %cst_27 [2] : vector<2x8x8xf32> to vector<2x8xf32>
    %65 = vector.shape_cast %64 : vector<2x8xf32> to vector<2x8x1xf32>
    %66 = tpu.reciprocal %65 {approx = true} : vector<2x8x1xf32> -> vector<2x8x1xf32>
    %67 = vector.broadcast %66 : vector<2x8x1xf32> to vector<2x8x8xf32>
    %68 = arith.mulf %63, %67 : vector<2x8x8xf32>
    %69 = arith.truncf %68 : vector<2x8x8xf32> to vector<2x8x8xbf16>
    "tpu.trace_start"() <{level = 10 : i32, message = "bqk,bkd->bqd"}> : () -> ()
    %cst_28 = arith.constant dense<0.000000e+00> : vector<2x8x8xf32>
    %70 = tpu.matmul %69, %55, %cst_28 {dimension_numbers = #tpu.dot_dimension_numbers<[2], [1], [1], [2], [0, 0, 0, 1, 1, 2], [0], [0]>} : vector<2x8x8xbf16>, vector<2x8x8xbf16>, vector<2x8x8xf32> -> vector<2x8x8xf32>
    "tpu.trace_stop"() : () -> ()
    %71 = vector.extract_strided_slice %42 {offsets = [0, 0, 8], sizes = [2, 8, 8], strides = [1, 1, 1]} : vector<2x8x32xf32> to vector<2x8x8xf32>
    %72 = arith.truncf %71 : vector<2x8x8xf32> to vector<2x8x8xbf16>
    %73 = vector.extract_strided_slice %43 {offsets = [0, 0, 8], sizes = [2, 8, 8], strides = [1, 1, 1]} : vector<2x8x32xf32> to vector<2x8x8xf32>
    %74 = arith.truncf %73 : vector<2x8x8xf32> to vector<2x8x8xbf16>
    %75 = vector.extract_strided_slice %44 {offsets = [0, 0, 8], sizes = [2, 8, 8], strides = [1, 1, 1]} : vector<2x8x32xf32> to vector<2x8x8xf32>
    %76 = arith.truncf %75 : vector<2x8x8xf32> to vector<2x8x8xbf16>
    "tpu.trace_start"() <{level = 10 : i32, message = "bqd,bkd->bqk"}> : () -> ()
    %cst_29 = arith.constant dense<0.000000e+00> : vector<2x8x8xf32>
    %77 = tpu.matmul %72, %74, %cst_29 {dimension_numbers = #tpu.dot_dimension_numbers<[2], [2], [1], [1], [0, 0, 0, 1, 1, 1], [0], [0]>} : vector<2x8x8xbf16>, vector<2x8x8xbf16>, vector<2x8x8xf32> -> vector<2x8x8xf32>
    "tpu.trace_stop"() : () -> ()
    %78 = vector.broadcast %49 : vector<2x1x8xf32> to vector<2x8x8xf32>
    %79 = arith.addf %77, %78 : vector<2x8x8xf32>
    %cst_30 = arith.constant dense<0xFF800000> : vector<2x8xf32>
    %80 = vector.multi_reduction <maximumf>, %79, %cst_30 [2] : vector<2x8x8xf32> to vector<2x8xf32>
    %81 = vector.shape_cast %80 : vector<2x8xf32> to vector<2x8x1xf32>
    %82 = vector.broadcast %81 : vector<2x8x1xf32> to vector<2x8x8xf32>
    %83 = arith.subf %79, %82 : vector<2x8x8xf32>
    %84 = math.exp %83 : vector<2x8x8xf32>
    %cst_31 = arith.constant dense<0.000000e+00> : vector<2x8xf32>
    %85 = vector.multi_reduction <add>, %84, %cst_31 [2] : vector<2x8x8xf32> to vector<2x8xf32>
    %86 = vector.shape_cast %85 : vector<2x8xf32> to vector<2x8x1xf32>
    %87 = tpu.reciprocal %86 {approx = true} : vector<2x8x1xf32> -> vector<2x8x1xf32>
    %88 = vector.broadcast %87 : vector<2x8x1xf32> to vector<2x8x8xf32>
    %89 = arith.mulf %84, %88 : vector<2x8x8xf32>
    %90 = arith.truncf %89 : vector<2x8x8xf32> to vector<2x8x8xbf16>
    "tpu.trace_start"() <{level = 10 : i32, message = "bqk,bkd->bqd"}> : () -> ()
    %cst_32 = arith.constant dense<0.000000e+00> : vector<2x8x8xf32>
    %91 = tpu.matmul %90, %76, %cst_32 {dimension_numbers = #tpu.dot_dimension_numbers<[2], [1], [1], [2], [0, 0, 0, 1, 1, 2], [0], [0]>} : vector<2x8x8xbf16>, vector<2x8x8xbf16>, vector<2x8x8xf32> -> vector<2x8x8xf32>
    "tpu.trace_stop"() : () -> ()
    %92 = vector.extract_strided_slice %42 {offsets = [0, 0, 16], sizes = [2, 8, 8], strides = [1, 1, 1]} : vector<2x8x32xf32> to vector<2x8x8xf32>
    %93 = arith.truncf %92 : vector<2x8x8xf32> to vector<2x8x8xbf16>
    %94 = vector.extract_strided_slice %43 {offsets = [0, 0, 16], sizes = [2, 8, 8], strides = [1, 1, 1]} : vector<2x8x32xf32> to vector<2x8x8xf32>
    %95 = arith.truncf %94 : vector<2x8x8xf32> to vector<2x8x8xbf16>
    %96 = vector.extract_strided_slice %44 {offsets = [0, 0, 16], sizes = [2, 8, 8], strides = [1, 1, 1]} : vector<2x8x32xf32> to vector<2x8x8xf32>
    %97 = arith.truncf %96 : vector<2x8x8xf32> to vector<2x8x8xbf16>
    "tpu.trace_start"() <{level = 10 : i32, message = "bqd,bkd->bqk"}> : () -> ()
    %cst_33 = arith.constant dense<0.000000e+00> : vector<2x8x8xf32>
    %98 = tpu.matmul %93, %95, %cst_33 {dimension_numbers = #tpu.dot_dimension_numbers<[2], [2], [1], [1], [0, 0, 0, 1, 1, 1], [0], [0]>} : vector<2x8x8xbf16>, vector<2x8x8xbf16>, vector<2x8x8xf32> -> vector<2x8x8xf32>
    "tpu.trace_stop"() : () -> ()
    %99 = vector.broadcast %49 : vector<2x1x8xf32> to vector<2x8x8xf32>
    %100 = arith.addf %98, %99 : vector<2x8x8xf32>
    %cst_34 = arith.constant dense<0xFF800000> : vector<2x8xf32>
    %101 = vector.multi_reduction <maximumf>, %100, %cst_34 [2] : vector<2x8x8xf32> to vector<2x8xf32>
    %102 = vector.shape_cast %101 : vector<2x8xf32> to vector<2x8x1xf32>
    %103 = vector.broadcast %102 : vector<2x8x1xf32> to vector<2x8x8xf32>
    %104 = arith.subf %100, %103 : vector<2x8x8xf32>
    %105 = math.exp %104 : vector<2x8x8xf32>
    %cst_35 = arith.constant dense<0.000000e+00> : vector<2x8xf32>
    %106 = vector.multi_reduction <add>, %105, %cst_35 [2] : vector<2x8x8xf32> to vector<2x8xf32>
    %107 = vector.shape_cast %106 : vector<2x8xf32> to vector<2x8x1xf32>
    %108 = tpu.reciprocal %107 {approx = true} : vector<2x8x1xf32> -> vector<2x8x1xf32>
    %109 = vector.broadcast %108 : vector<2x8x1xf32> to vector<2x8x8xf32>
    %110 = arith.mulf %105, %109 : vector<2x8x8xf32>
    %111 = arith.truncf %110 : vector<2x8x8xf32> to vector<2x8x8xbf16>
    "tpu.trace_start"() <{level = 10 : i32, message = "bqk,bkd->bqd"}> : () -> ()
    %cst_36 = arith.constant dense<0.000000e+00> : vector<2x8x8xf32>
    %112 = tpu.matmul %111, %97, %cst_36 {dimension_numbers = #tpu.dot_dimension_numbers<[2], [1], [1], [2], [0, 0, 0, 1, 1, 2], [0], [0]>} : vector<2x8x8xbf16>, vector<2x8x8xbf16>, vector<2x8x8xf32> -> vector<2x8x8xf32>
    "tpu.trace_stop"() : () -> ()
    %113 = vector.extract_strided_slice %42 {offsets = [0, 0, 24], sizes = [2, 8, 8], strides = [1, 1, 1]} : vector<2x8x32xf32> to vector<2x8x8xf32>
    %114 = arith.truncf %113 : vector<2x8x8xf32> to vector<2x8x8xbf16>
    %115 = vector.extract_strided_slice %43 {offsets = [0, 0, 24], sizes = [2, 8, 8], strides = [1, 1, 1]} : vector<2x8x32xf32> to vector<2x8x8xf32>
    %116 = arith.truncf %115 : vector<2x8x8xf32> to vector<2x8x8xbf16>
    %117 = vector.extract_strided_slice %44 {offsets = [0, 0, 24], sizes = [2, 8, 8], strides = [1, 1, 1]} : vector<2x8x32xf32> to vector<2x8x8xf32>
    %118 = arith.truncf %117 : vector<2x8x8xf32> to vector<2x8x8xbf16>
    "tpu.trace_start"() <{level = 10 : i32, message = "bqd,bkd->bqk"}> : () -> ()
    %cst_37 = arith.constant dense<0.000000e+00> : vector<2x8x8xf32>
    %119 = tpu.matmul %114, %116, %cst_37 {dimension_numbers = #tpu.dot_dimension_numbers<[2], [2], [1], [1], [0, 0, 0, 1, 1, 1], [0], [0]>} : vector<2x8x8xbf16>, vector<2x8x8xbf16>, vector<2x8x8xf32> -> vector<2x8x8xf32>
    "tpu.trace_stop"() : () -> ()
    %120 = vector.broadcast %49 : vector<2x1x8xf32> to vector<2x8x8xf32>
    %121 = arith.addf %119, %120 : vector<2x8x8xf32>
    %cst_38 = arith.constant dense<0xFF800000> : vector<2x8xf32>
    %122 = vector.multi_reduction <maximumf>, %121, %cst_38 [2] : vector<2x8x8xf32> to vector<2x8xf32>
    %123 = vector.shape_cast %122 : vector<2x8xf32> to vector<2x8x1xf32>
    %124 = vector.broadcast %123 : vector<2x8x1xf32> to vector<2x8x8xf32>
    %125 = arith.subf %121, %124 : vector<2x8x8xf32>
    %126 = math.exp %125 : vector<2x8x8xf32>
    %cst_39 = arith.constant dense<0.000000e+00> : vector<2x8xf32>
    %127 = vector.multi_reduction <add>, %126, %cst_39 [2] : vector<2x8x8xf32> to vector<2x8xf32>
    %128 = vector.shape_cast %127 : vector<2x8xf32> to vector<2x8x1xf32>
    %129 = tpu.reciprocal %128 {approx = true} : vector<2x8x1xf32> -> vector<2x8x1xf32>
    %130 = vector.broadcast %129 : vector<2x8x1xf32> to vector<2x8x8xf32>
    %131 = arith.mulf %126, %130 : vector<2x8x8xf32>
    %132 = arith.truncf %131 : vector<2x8x8xf32> to vector<2x8x8xbf16>
    "tpu.trace_start"() <{level = 10 : i32, message = "bqk,bkd->bqd"}> : () -> ()
    %cst_40 = arith.constant dense<0.000000e+00> : vector<2x8x8xf32>
    %133 = tpu.matmul %132, %118, %cst_40 {dimension_numbers = #tpu.dot_dimension_numbers<[2], [1], [1], [2], [0, 0, 0, 1, 1, 2], [0], [0]>} : vector<2x8x8xbf16>, vector<2x8x8xbf16>, vector<2x8x8xf32> -> vector<2x8x8xf32>
    "tpu.trace_stop"() : () -> ()
    %134 = tpu.concatenate %70, %91, %112, %133 in 2 : vector<2x8x8xf32>, vector<2x8x8xf32>, vector<2x8x8xf32>, vector<2x8x8xf32> -> vector<2x8x32xf32>
    %135 = vector.shape_cast %134 : vector<2x8x32xf32> to vector<16x32xf32>
    %136 = arith.truncf %135 : vector<16x32xf32> to vector<16x32xbf16>
    %c0_41 = arith.constant 0 : index
    %c0_42 = arith.constant 0 : index
    %c0_43 = arith.constant 0 : index
    %137 = vector.load %arg9[%c0_41, %c0_42, %c0_43] : memref<1x32x32xbf16, #tpu.memory_space<vmem>>, vector<1x32x32xbf16>
    %138 = vector.shape_cast %137 : vector<1x32x32xbf16> to vector<32x32xbf16>
    %cst_44 = arith.constant dense<0.000000e+00> : vector<16x32xf32>
    %139 = tpu.matmul %136, %138, %cst_44 {dimension_numbers = #tpu.dot_dimension_numbers<[1], [0], [0], [1], [0, 0, 1, 1], [], []>} : vector<16x32xbf16>, vector<32x32xbf16>, vector<16x32xf32> -> vector<16x32xf32>
    %c0_45 = arith.constant 0 : index
    %c0_46 = arith.constant 0 : index
    %c0_47 = arith.constant 0 : index
    %140 = vector.load %arg10[%c0_45, %c0_46, %c0_47] : memref<1x1x32xf32, #tpu.memory_space<vmem>>, vector<1x1x32xf32>
    %141 = vector.shape_cast %140 : vector<1x1x32xf32> to vector<1x32xf32>
    %142 = vector.broadcast %141 : vector<1x32xf32> to vector<16x32xf32>
    %143 = arith.addf %139, %142 : vector<16x32xf32>
    %144 = vector.shape_cast %143 : vector<16x32xf32> to vector<2x8x32xf32>
    %145 = arith.addf %3, %144 : vector<2x8x32xf32>
    %c0_48 = arith.constant 0 : index
    %c0_49 = arith.constant 0 : index
    %c0_50 = arith.constant 0 : index
    %146 = vector.load %arg11[%c0_48, %c0_49, %c0_50] : memref<1x1x32xf32, #tpu.memory_space<vmem>>, vector<1x1x32xf32>
    %147 = vector.shape_cast %146 : vector<1x1x32xf32> to vector<1x32xf32>
    %c0_51 = arith.constant 0 : index
    %c0_52 = arith.constant 0 : index
    %c0_53 = arith.constant 0 : index
    %148 = vector.load %arg12[%c0_51, %c0_52, %c0_53] : memref<1x1x32xf32, #tpu.memory_space<vmem>>, vector<1x1x32xf32>
    %149 = vector.shape_cast %148 : vector<1x1x32xf32> to vector<1x32xf32>
    %cst_54 = arith.constant dense<0.000000e+00> : vector<2x8xf32>
    %150 = vector.multi_reduction <add>, %145, %cst_54 [2] : vector<2x8x32xf32> to vector<2x8xf32>
    %151 = vector.shape_cast %150 : vector<2x8xf32> to vector<2x8x1xf32>
    %cst_55 = arith.constant 3.200000e+01 : f32
    %152 = vector.broadcast %cst_55 : f32 to vector<2x8x1xf32>
    %153 = arith.divf %151, %152 : vector<2x8x1xf32>
    %154 = vector.broadcast %153 : vector<2x8x1xf32> to vector<2x8x32xf32>
    %155 = arith.subf %145, %154 : vector<2x8x32xf32>
    %156 = arith.mulf %155, %155 : vector<2x8x32xf32>
    %cst_56 = arith.constant dense<0.000000e+00> : vector<2x8xf32>
    %157 = vector.multi_reduction <add>, %156, %cst_56 [2] : vector<2x8x32xf32> to vector<2x8xf32>
    %158 = vector.shape_cast %157 : vector<2x8xf32> to vector<2x8x1xf32>
    %cst_57 = arith.constant 3.200000e+01 : f32
    %159 = vector.broadcast %cst_57 : f32 to vector<2x8x1xf32>
    %160 = arith.divf %158, %159 : vector<2x8x1xf32>
    %161 = vector.broadcast %153 : vector<2x8x1xf32> to vector<2x8x32xf32>
    %162 = arith.subf %145, %161 : vector<2x8x32xf32>
    %cst_58 = arith.constant 9.99999974E-6 : f32
    %163 = vector.broadcast %cst_58 : f32 to vector<2x8x1xf32>
    %164 = arith.addf %160, %163 : vector<2x8x1xf32>
    %165 = math.rsqrt %164 : vector<2x8x1xf32>
    %166 = vector.broadcast %165 : vector<2x8x1xf32> to vector<2x8x32xf32>
    %167 = arith.mulf %162, %166 : vector<2x8x32xf32>
    %168 = vector.shape_cast %147 : vector<1x32xf32> to vector<1x1x32xf32>
    %169 = vector.broadcast %168 : vector<1x1x32xf32> to vector<2x8x32xf32>
    %170 = arith.mulf %167, %169 : vector<2x8x32xf32>
    %171 = vector.shape_cast %149 : vector<1x32xf32> to vector<1x1x32xf32>
    %172 = vector.broadcast %171 : vector<1x1x32xf32> to vector<2x8x32xf32>
    %173 = arith.addf %170, %172 : vector<2x8x32xf32>
    %174 = vector.shape_cast %173 : vector<2x8x32xf32> to vector<16x32xf32>
    %175 = arith.truncf %174 : vector<16x32xf32> to vector<16x32xbf16>
    %c0_59 = arith.constant 0 : index
    %c0_60 = arith.constant 0 : index
    %c0_61 = arith.constant 0 : index
    %176 = vector.load %arg13[%c0_59, %c0_60, %c0_61] : memref<1x32x128xbf16, #tpu.memory_space<vmem>>, vector<1x32x128xbf16>
    %177 = vector.shape_cast %176 : vector<1x32x128xbf16> to vector<32x128xbf16>
    %cst_62 = arith.constant dense<0.000000e+00> : vector<16x128xf32>
    %178 = tpu.matmul %175, %177, %cst_62 {dimension_numbers = #tpu.dot_dimension_numbers<[1], [0], [0], [1], [0, 0, 1, 1], [], []>} : vector<16x32xbf16>, vector<32x128xbf16>, vector<16x128xf32> -> vector<16x128xf32>
    %c0_63 = arith.constant 0 : index
    %c0_64 = arith.constant 0 : index
    %c0_65 = arith.constant 0 : index
    %179 = vector.load %arg14[%c0_63, %c0_64, %c0_65] : memref<1x1x128xf32, #tpu.memory_space<vmem>>, vector<1x1x128xf32>
    %180 = vector.shape_cast %179 : vector<1x1x128xf32> to vector<1x128xf32>
    %181 = vector.broadcast %180 : vector<1x128xf32> to vector<16x128xf32>
    %182 = arith.addf %178, %181 : vector<16x128xf32>
    %cst_66 = arith.constant 0.000000e+00 : f32
    %183 = vector.broadcast %cst_66 : f32 to vector<16x128xf32>
    %184 = arith.maximumf %182, %183 : vector<16x128xf32>
    %185 = arith.truncf %184 : vector<16x128xf32> to vector<16x128xbf16>
    %c0_67 = arith.constant 0 : index
    %c0_68 = arith.constant 0 : index
    %c0_69 = arith.constant 0 : index
    %186 = vector.load %arg15[%c0_67, %c0_68, %c0_69] : memref<1x128x32xbf16, #tpu.memory_space<vmem>>, vector<1x128x32xbf16>
    %187 = vector.shape_cast %186 : vector<1x128x32xbf16> to vector<128x32xbf16>
    %cst_70 = arith.constant dense<0.000000e+00> : vector<16x32xf32>
    %188 = tpu.matmul %185, %187, %cst_70 {dimension_numbers = #tpu.dot_dimension_numbers<[1], [0], [0], [1], [0, 0, 1, 1], [], []>} : vector<16x128xbf16>, vector<128x32xbf16>, vector<16x32xf32> -> vector<16x32xf32>
    %c0_71 = arith.constant 0 : index
    %c0_72 = arith.constant 0 : index
    %c0_73 = arith.constant 0 : index
    %189 = vector.load %arg16[%c0_71, %c0_72, %c0_73] : memref<1x1x32xf32, #tpu.memory_space<vmem>>, vector<1x1x32xf32>
    %190 = vector.shape_cast %189 : vector<1x1x32xf32> to vector<1x32xf32>
    %191 = vector.broadcast %190 : vector<1x32xf32> to vector<16x32xf32>
    %192 = arith.addf %188, %191 : vector<16x32xf32>
    %193 = vector.shape_cast %192 : vector<16x32xf32> to vector<2x8x32xf32>
    %194 = arith.addf %145, %193 : vector<2x8x32xf32>
    %c0_74 = arith.constant 0 : index
    %c0_75 = arith.constant 0 : index
    %c0_76 = arith.constant 0 : index
    %195 = vector.load %arg20[%c0_74, %c0_75, %c0_76] : memref<2x8x32xf32, #tpu.memory_space<vmem>>, vector<2x8x32xf32>
    tpu.vector_store %arg20[%c0_74, %c0_75, %c0_76], %194 {strides = array<i32>} : memref<2x8x32xf32, #tpu.memory_space<vmem>>, vector<2x8x32xf32>,
    %c1_i32 = arith.constant 1 : i32
    %196 = arith.cmpi eq, %arg1, %c1_i32 : i32
    %197 = arith.extui %196 : i1 to i32
    %c0_i32_77 = arith.constant 0 : i32
    %198 = arith.cmpi ne, %197, %c0_i32_77 : i32
    scf.if %198 {
      %c0_78 = arith.constant 0 : index
      %c0_79 = arith.constant 0 : index
      %c0_80 = arith.constant 0 : index
      %199 = vector.load %arg4[%c0_78, %c0_79, %c0_80] : memref<2x8x1xf32, #tpu.memory_space<vmem>>, vector<2x8x1xf32>
      %200 = vector.broadcast %199 : vector<2x8x1xf32> to vector<2x8x32xf32>
      %201 = arith.mulf %194, %200 : vector<2x8x32xf32>
      %cst_81 = arith.constant dense<0.000000e+00> : vector<2x32xf32>
      %202 = vector.multi_reduction <add>, %201, %cst_81 [1] : vector<2x8x32xf32> to vector<2x32xf32>
      %cst_82 = arith.constant dense<0.000000e+00> : vector<2x1xf32>
      %203 = vector.multi_reduction <add>, %199, %cst_82 [1] : vector<2x8x1xf32> to vector<2x1xf32>
      %cst_83 = arith.constant 1.000000e+00 : f32
      %204 = vector.broadcast %cst_83 : f32 to vector<2x1xf32>
      %205 = arith.maximumf %203, %204 : vector<2x1xf32>
      %206 = vector.broadcast %205 : vector<2x1xf32> to vector<2x32xf32>
      %207 = arith.divf %202, %206 : vector<2x32xf32>
      %208 = arith.truncf %207 : vector<2x32xf32> to vector<2x32xbf16>
      %c0_84 = arith.constant 0 : index
      %c0_85 = arith.constant 0 : index
      %209 = vector.load %arg17[%c0_84, %c0_85] : memref<32x32xbf16, #tpu.memory_space<vmem>>, vector<32x32xbf16>
      %cst_86 = arith.constant dense<0.000000e+00> : vector<2x32xf32>
      %210 = tpu.matmul %208, %209, %cst_86 {dimension_numbers = #tpu.dot_dimension_numbers<[1], [0], [0], [1], [0, 0, 1, 1], [], []>} : vector<2x32xbf16>, vector<32x32xbf16>, vector<2x32xf32> -> vector<2x32xf32>
      %c0_87 = arith.constant 0 : index
      %c0_88 = arith.constant 0 : index
      %211 = vector.load %arg18[%c0_87, %c0_88] : memref<1x32xf32, #tpu.memory_space<vmem>>, vector<1x32xf32>
      %212 = vector.broadcast %211 : vector<1x32xf32> to vector<2x32xf32>
      %213 = arith.addf %210, %212 : vector<2x32xf32>
      %214 = arith.mulf %213, %213 : vector<2x32xf32>
      %cst_89 = arith.constant dense<0.000000e+00> : vector<2xf32>
      %215 = vector.multi_reduction <add>, %214, %cst_89 [1] : vector<2x32xf32> to vector<2xf32>
      %216 = vector.shape_cast %215 : vector<2xf32> to vector<2x1xf32>
      %217 = math.sqrt %216 : vector<2x1xf32>
      %cst_90 = arith.constant 9.99999996E-13 : f32
      %218 = vector.broadcast %cst_90 : f32 to vector<2x1xf32>
      %219 = arith.maximumf %217, %218 : vector<2x1xf32>
      %220 = vector.broadcast %219 : vector<2x1xf32> to vector<2x32xf32>
      %221 = arith.divf %213, %220 : vector<2x32xf32>
      %c0_91 = arith.constant 0 : index
      %c0_92 = arith.constant 0 : index
      %222 = vector.load %arg19[%c0_91, %c0_92] : memref<2x32xf32, #tpu.memory_space<vmem>>, vector<2x32xf32>
      tpu.vector_store %arg19[%c0_91, %c0_92], %221 {strides = array<i32>} : memref<2x32xf32, #tpu.memory_space<vmem>>, vector<2x32xf32>,
    } else {
    }
    return
  }
  func.func @transform_0(%arg0: i32, %arg1: i32) -> (i32, i32, i32) {
    %c0_i32 = arith.constant 0 : i32
    %c0_i32_0 = arith.constant 0 : i32
    %c0_i32_1 = arith.constant 0 : i32
    return %arg0, %c0_i32, %c0_i32_0 : i32, i32, i32
  }
  func.func @transform_1(%arg0: i32, %arg1: i32) -> (i32, i32, i32) {
    %c0_i32 = arith.constant 0 : i32
    %c0_i32_0 = arith.constant 0 : i32
    %c0_i32_1 = arith.constant 0 : i32
    return %arg0, %c0_i32, %c0_i32_0 : i32, i32, i32
  }
  func.func @transform_2(%arg0: i32, %arg1: i32) -> (i32, i32, i32) {
    %c0_i32 = arith.constant 0 : i32
    %c0_i32_0 = arith.constant 0 : i32
    %c0_i32_1 = arith.constant 0 : i32
    return %arg0, %c0_i32, %c0_i32_0 : i32, i32, i32
  }
  func.func @transform_3(%arg0: i32, %arg1: i32) -> (i32, i32, i32) {
    %c0_i32 = arith.constant 0 : i32
    %c0_i32_0 = arith.constant 0 : i32
    %c0_i32_1 = arith.constant 0 : i32
    return %arg1, %c0_i32, %c0_i32_0 : i32, i32, i32
  }
  func.func @transform_4(%arg0: i32, %arg1: i32) -> (i32, i32, i32) {
    %c0_i32 = arith.constant 0 : i32
    %c0_i32_0 = arith.constant 0 : i32
    %c0_i32_1 = arith.constant 0 : i32
    return %arg1, %c0_i32, %c0_i32_0 : i32, i32, i32
  }
  func.func @transform_5(%arg0: i32, %arg1: i32) -> (i32, i32, i32) {
    %c0_i32 = arith.constant 0 : i32
    %c0_i32_0 = arith.constant 0 : i32
    %c0_i32_1 = arith.constant 0 : i32
    return %arg1, %c0_i32, %c0_i32_0 : i32, i32, i32
  }
  func.func @transform_6(%arg0: i32, %arg1: i32) -> (i32, i32, i32) {
    %c0_i32 = arith.constant 0 : i32
    %c0_i32_0 = arith.constant 0 : i32
    %c0_i32_1 = arith.constant 0 : i32
    return %arg1, %c0_i32, %c0_i32_0 : i32, i32, i32
  }
  func.func @transform_7(%arg0: i32, %arg1: i32) -> (i32, i32, i32) {
    %c0_i32 = arith.constant 0 : i32
    %c0_i32_0 = arith.constant 0 : i32
    %c0_i32_1 = arith.constant 0 : i32
    return %arg1, %c0_i32, %c0_i32_0 : i32, i32, i32
  }
  func.func @transform_8(%arg0: i32, %arg1: i32) -> (i32, i32, i32) {
    %c0_i32 = arith.constant 0 : i32
    %c0_i32_0 = arith.constant 0 : i32
    %c0_i32_1 = arith.constant 0 : i32
    return %arg1, %c0_i32, %c0_i32_0 : i32, i32, i32
  }
  func.func @transform_9(%arg0: i32, %arg1: i32) -> (i32, i32, i32) {
    %c0_i32 = arith.constant 0 : i32
    %c0_i32_0 = arith.constant 0 : i32
    %c0_i32_1 = arith.constant 0 : i32
    return %arg1, %c0_i32, %c0_i32_0 : i32, i32, i32
  }
  func.func @transform_10(%arg0: i32, %arg1: i32) -> (i32, i32, i32) {
    %c0_i32 = arith.constant 0 : i32
    %c0_i32_0 = arith.constant 0 : i32
    %c0_i32_1 = arith.constant 0 : i32
    return %arg1, %c0_i32, %c0_i32_0 : i32, i32, i32
  }
  func.func @transform_11(%arg0: i32, %arg1: i32) -> (i32, i32, i32) {
    %c0_i32 = arith.constant 0 : i32
    %c0_i32_0 = arith.constant 0 : i32
    %c0_i32_1 = arith.constant 0 : i32
    return %arg1, %c0_i32, %c0_i32_0 : i32, i32, i32
  }
  func.func @transform_12(%arg0: i32, %arg1: i32) -> (i32, i32, i32) {
    %c0_i32 = arith.constant 0 : i32
    %c0_i32_0 = arith.constant 0 : i32
    %c0_i32_1 = arith.constant 0 : i32
    return %arg1, %c0_i32, %c0_i32_0 : i32, i32, i32
  }
  func.func @transform_13(%arg0: i32, %arg1: i32) -> (i32, i32, i32) {
    %c0_i32 = arith.constant 0 : i32
    %c0_i32_0 = arith.constant 0 : i32
    %c0_i32_1 = arith.constant 0 : i32
    return %arg1, %c0_i32, %c0_i32_0 : i32, i32, i32
  }
  func.func @transform_14(%arg0: i32, %arg1: i32) -> (i32, i32, i32) {
    %c0_i32 = arith.constant 0 : i32
    %c0_i32_0 = arith.constant 0 : i32
    %c0_i32_1 = arith.constant 0 : i32
    return %arg1, %c0_i32, %c0_i32_0 : i32, i32, i32
  }
  func.func @transform_15(%arg0: i32, %arg1: i32) -> (i32, i32) {
    %c0_i32 = arith.constant 0 : i32
    %c0_i32_0 = arith.constant 0 : i32
    %c0_i32_1 = arith.constant 0 : i32
    return %c0_i32, %c0_i32_0 : i32, i32
  }
  func.func @transform_16(%arg0: i32, %arg1: i32) -> (i32, i32) {
    %c0_i32 = arith.constant 0 : i32
    %c0_i32_0 = arith.constant 0 : i32
    %c0_i32_1 = arith.constant 0 : i32
    return %c0_i32, %c0_i32_0 : i32, i32
  }
  func.func @transform_17(%arg0: i32, %arg1: i32) -> (i32, i32) {
    %c0_i32 = arith.constant 0 : i32
    %c0_i32_0 = arith.constant 0 : i32
    return %arg0, %c0_i32 : i32, i32
  }
}

</mosaic_0001>

<bundles_post_ra>
// kernel: transformer_text_encoder.1
= control target key start
LH: loop header
LB: loop body
LE: loop exit
PB: predicated region body
PF: predicated region fallthrough
CT: control target
= control target key end

     0   :  { %s2748_s0 = inlined_call_operand.vmem [shape: f32[2,8,32], index: 0, kind: input, shape index: {}]   ;;  %s2749_s1 = inlined_call_operand.vmem [shape: f32[2,1,8], index: 1, kind: input, shape index: {}]   ;;  %s2750_s2 = inlined_call_operand.vmem [shape: f32[2,8,1], index: 2, kind: input, shape index: {}]   ;;  %s2751_s3 = inlined_call_operand.vmem [shape: f32[2,1,32], index: 3, kind: input, shape index: {}]   ;;  %s2752_s4 = inlined_call_operand.vmem [shape: f32[2,1,32], index: 4, kind: input, shape index: {}]   ;;  %s2753_s5 = inlined_call_operand.vmem [shape: bf16[2,32,96], index: 5, kind: input, shape index: {}]   ;;  %s2754_s6 = inlined_call_operand.vmem [shape: f32[2,1,96], index: 6, kind: input, shape index: {}]   ;;  %s2755_s7 = inlined_call_operand.vmem [shape: bf16[2,32,32], index: 7, kind: input, shape index: {}]   ;;  %s2756_s8 = inlined_call_operand.vmem [shape: f32[2,1,32], index: 8, kind: input, shape index: {}]   ;;  %s2757_s9 = inlined_call_operand.vmem [shape: f32[2,1,32], index: 9, kind: input, shape index: {}]   ;;  %s2758_s10 = inlined_call_operand.vmem [shape: f32[2,1,32], index: 10, kind: input, shape index: {}]   ;;  %s2759_s11 = inlined_call_operand.vmem [shape: bf16[2,32,128], index: 11, kind: input, shape index: {}]   ;;  %s2760_s12 = inlined_call_operand.vmem [shape: f32[2,1,128], index: 12, kind: input, shape index: {}]   ;;  %s2761_s13 = inlined_call_operand.vmem [shape: bf16[2,128,32], index: 13, kind: input, shape index: {}]   ;;  %s2762_s14 = inlined_call_operand.vmem [shape: f32[2,1,32], index: 14, kind: input, shape index: {}]   ;;  %s2763_s15 = inlined_call_operand.vmem [shape: bf16[32,32], index: 15, kind: input, shape index: {}]   ;;  %s2764_s16 = inlined_call_operand.vmem [shape: f32[1,32], index: 16, kind: input, shape index: {}]   ;;  %s2765_s17 = inlined_call_operand.hbm [shape: f32[2,32], index: 17, kind: output, shape index: {}]  }
   0x1   :  { %2772 = sst [smem:[#allocation9_spill]] %s2748_s0 }
   0x2   :  { %2773 = sst [smem:[#allocation10_spill]] %s2749_s1 }
   0x3   :  { %2774 = sst [smem:[#allocation11_spill]] %s2750_s2 }
   0x4   :  { %2775 = sst [smem:[#allocation12_spill]] %s2753_s5 }
   0x5   :  { %2776 = sst [smem:[#allocation13_spill]] %s2755_s7 }
   0x6   :  { %2777 = sst [smem:[#allocation14_spill]] %s2763_s15 }
   0x7   :  { %2778 = sst [smem:[#allocation15_spill]] %s2764_s16 }
   0x8   :  { %2779 = sst [smem:[#allocation16_spill]] %s2765_s17 }
   0x9   :  { %22 = vsyncpa [#allocation4], 0  ;;  %s2414_s24 = smov 0   ;;  %s2416_s25 = smov 0  }
   0xa   :  { %s2418_s26 = smov 0  }
   0xb LB: > { %2780 = sst [smem:[#allocation6_spill]] %s2301_s25  ;;  %s37_s28 = sadd.s32 1, %s2301_s25  ;;  %s2305_s26 = sphi %s2418_s26, %s28_s26   ;;  %s2301_s25 = sphi %s2416_s25, %s2799_s25   ;;  %s2297_s24 = sphi %s2414_s24, %s2798_s24  }
   0xc   : > { %2781 = sst [smem:[#allocation7_spill]] %s2305_s26  ;;  %p38_p0 = scmp.ge.s32.totalorder %s37_s28, 2 }
   0xd   : > { %p2007_p1 = scmp.ge.s32.totalorder %s2305_s26, 1  ;;  %p626_p2 = scmp.lt.s32.totalorder %s2305_s26, 3 }
   0xe   : > { %s2801_s28 = smov (%p38_p0, %s37_s28), 0 }
   0xf   : > { %2782 = sst [smem:[#allocation8_spill]] %s2801_s28  ;;  %p627_p3 = pnand %p2007_p1, %p626_p2 }
  0x10   : > { %p743_p4 = scmp.lt.s32.totalorder (!%p627_p3), %s2297_s24, 1  ;;  %s2783_s5 = sld [smem:[#allocation12_spill]] (!%p627_p3) }
  0x11   : > { %630 = sbr.rel (%p627_p3) target bundleno = 2487 (0x9b7), region = 88  ;;  %s2784_s7 = sld [smem:[#allocation13_spill]] (!%p627_p3) }
  0x12   : > { %p2016_p5 = scmp.ne.s32.totalorder (!%p627_p3), %s2297_s24, 0 }
  0x16   : > { %s2437_s29 = scalar_select %p743_p4, %s2297_s24, 1 }
  0x17   : > { %s2785_s0 = sld [smem:[#allocation9_spill]] (!%p2016_p5) }
  0x18   : > { %s2108_s21 = sshll.u32 %s2437_s29, 4  ;;  %s767_s15 = scalar_lea.vmem %s2757_s9, %s2437_s29 }
  0x19   : > { %s2455_s28 = scalar_lea.vmem %s2783_s5, %s2108_s21  ;;  %s2460_s26 = scalar_lea.vmem %s2784_s7, %s2108_s21 }
  0x1a   : > { %s770_s27 = scalar_lea.vmem %s2758_s10, %s2437_s29  ;;  %s2477_s5 = scalar_lea.vmem %s2759_s11, %s2108_s21 }
  0x1b   : > { %s778_s7 = scalar_lea.vmem %s2760_s12, %s2437_s29  ;;  %s2111_s2 = sshll.u32 %s2437_s29, 6 }
  0x1c   : > { %s2487_s19 = scalar_lea.vmem %s2761_s13, %s2111_s2  ;;  %s786_s22 = scalar_lea.vmem %s2762_s14, %s2437_s29 }
  0x1d   : > { %791 = sbr.rel (%p2016_p5) target bundleno = 37 (0x25), region = 92 }
  0x22   : > { %v792_v0 = vld [vmem:[%s2785_s0] sm:$0xff]  ;;  %vm794_vm0 = vcmask 261120   ;;  %v793_v1 = vld [vmem:[%s2785_s0 + $0x8] sm:$0xff] }
  0x23   : > { %795 = vst.msk [vmem:[#allocation2] sm:$0xff] %vm794_vm0, %v792_v0 }
  0x24   : > { %796 = vst.msk [vmem:[#allocation2 + $0x8] sm:$0xff] %vm794_vm0, %v793_v1 }
  0x25 PF: > { %vm801_vm1 = vcmask 261120   ;;  %v2307_v6 = vmov 32.0   ;;  %v2113_v23 = vld [vmem:[%s2455_s28 + $0x8] sm:$0xff]  ;;  %v2112_v25 = vld [vmem:[%s2455_s28] sm:$0xff]  ;;  %s2786_s25 = scalar_lea.vmem %s2751_s3, %s2437_s29  ;;  %s2787_s20 = scalar_lea.vmem %s2752_s4, %s2437_s29  ;;  %vm920_vm9 = vcmask 64512   ;;  %vm993_vm10 = vcmask 1043456  }
  0x26   : > { %2198 = vrcp.f32 %v2307_v6  ;;  %893 = vmatpush.bf16.msra.mxu0 %v2113_v23  ;;  %v2190_v44 = vld [vmem:[%s2786_s25] ss:$0 sm:$0xff]  ;;  %s2788_s21 = scalar_lea.vmem %s2754_s6, %s2437_s29  ;;  %s2308_s30 = smov 120   ;;  %vm1393_vm11 = vcmask 130048   ;;  %vm1396_vm12 = vcmask 195584  }
  0x27   : > { %v2191_v49 = vld [vmem:[%s2787_s20] ss:$0 sm:$0xff]  ;;  %s2309_s17 = smov 88   ;;  %s2310_s2 = smov 96  }
  0x28   : > { %v2192_v54 = vld [vmem:[%s2788_s21] ss:$0 sm:$0xff]  ;;  %s2311_s28 = smov 112   ;;  %s2312_s25 = smov 80  }
  0x29   : > { %s2313_s16 = smov 104   ;;  %s2314_s18 = smov 72  }
  0x2a   : > { %v2500_v2 = vld [vmem:[#allocation2] sm:$0xff]  ;;  %894 = vmatpush.bf16.msra.mxu0 %v2112_v25  ;;  %s2315_s20 = smov 64   ;;  %s2789_s21 = sld [smem:[#allocation10_spill]] }
  0x2b   : > { %v802_v3 = vsel %vm801_vm1, %v2500_v2, 0.0  ;;  %v2504_v4 = vld [vmem:[#allocation2 + $0x8] sm:$0xff]  ;;  %s2790_s23 = scalar_lea.vmem %s2756_s8, %s2437_s29  ;;  %p2094_p6 = scmp.ne.s32.totalorder %s2297_s24, 1 }
  0x2c   : > { %803 = vadd.xlane.f32.xlu0 %v802_v3  ;;  %v805_v5 = vsel %vm801_vm1, %v2504_v4, 0.0  ;;  %v2199_v7 = vpop.eup %2198 }
  0x2d   : > { %v809_v8 = vmul.f32 32.0, %v2199_v7  ;;  %vm813_vm2 = vweird.f32 %v2199_v7 }
  0x2f   : > { %v810_v9 = vsub.f32 1.0, %v809_v8 }
  0x31   : > { %v811_v10 = vmul.f32 %v2199_v7, %v810_v9 }
  0x33   : > { %v812_v11 = vadd.f32 %v2199_v7, %v811_v10 }
  0x34   : > { %806 = vadd.xlane.f32.xlu0 %v805_v5 }
  0x35   : > { %v2508_v12 = vsel %vm813_vm2, %v2199_v7, %v812_v11 }
  0x9f   : > { %v804_v13 = vpop.xlane.xlu0 %803 }
  0xa0   : > { %v815_v14 = vmul.f32 %v2508_v12, %v804_v13 }
  0xa2   : > { %v817_v15 = vsub.f32 %v2500_v2, %v815_v14 }
  0xa4   : > { %v819_v16 = vmul.f32 %v817_v15, %v817_v15 }
  0xa6   : > { %v821_v17 = vsel %vm801_vm1, %v819_v16, 0.0 }
  0xa7   : > { %822 = vadd.xlane.f32.xlu1 %v821_v17  ;;  %v807_v18 = vpop.xlane.xlu0 %806 }
  0xa8   : > { %v816_v19 = vmul.f32 %v2508_v12, %v807_v18 }
  0xaa   : > { %v818_v20 = vsub.f32 %v2504_v4, %v816_v19 }
  0xac   : > { %v820_v21 = vmul.f32 %v818_v20, %v818_v20 }
  0xae   : > { %v824_v22 = vsel %vm801_vm1, %v820_v21, 0.0 }
  0xaf   : > { %825 = vadd.xlane.f32.xlu1 %v824_v22 }
 0x11a   : > { %v823_v24 = vpop.xlane.xlu1 %822 }
 0x11b   : > { %v827_v26 = vmul.f32 %v823_v24, %v2508_v12 }
 0x11d   : > { %v829_v27 = vadd.f32 1e-05, %v827_v26 }
 0x11f   : > { %2200 = vrsqrt.f32 %v829_v27  ;;  %vm837_vm4 = vweird.f32 %v829_v27 }
 0x122   : > { %v826_v28 = vpop.xlane.xlu1 %825 }
 0x123   : > { %v828_v29 = vmul.f32 %v826_v28, %v2508_v12  ;;  %v901_v28 = vld [vmem:[%s2789_s21] sm:$0x1] }
 0x125   : > { %v2201_v30 = vpop.eup %2200  ;;  %v830_v31 = vadd.f32 1e-05, %v828_v29  ;;  %v2026_v29 = vadd.f32 -1.0, %v901_v28 }
 0x126   : > { %v832_v32 = vmul.f32 %v2201_v30, %v829_v27  ;;  %vm838_vm3 = vweird.f32 %v2201_v30 }
 0x127   : > { %2202 = vrsqrt.f32 %v830_v31  ;;  %vm839_vm5 = vmor %vm837_vm4, %vm838_vm3  ;;  %vm847_vm7 = vweird.f32 %v830_v31 }
 0x128   : > { %v833_v33 = vmul.f32 %v2201_v30, %v832_v32 }
 0x12a   : > { %v834_v34 = vmul.f32 0.5, %v833_v33  ;;  %v902_v33 = vld [vmem:[%s2789_s21 + $0x1] sm:$0x1] }
 0x12c   : > { %v835_v35 = vsub.f32 1.5, %v834_v34 }
 0x12d   : > { %v2203_v36 = vpop.eup %2202 }
 0x12e   : > { %v836_v37 = vmul.f32 %v2201_v30, %v835_v35  ;;  %v842_v38 = vmul.f32 %v2203_v36, %v830_v31  ;;  %vm848_vm6 = vweird.f32 %v2203_v36 }
 0x12f   : > { %vm849_vm8 = vmor %vm847_vm7, %vm848_vm6 }
 0x130   : > { %v843_v39 = vmul.f32 %v2203_v36, %v842_v38  ;;  %v840_v40 = vsel %vm839_vm5, %v2201_v30, %v836_v37  ;;  %v905_v30 = vmul.f32 1e+30, %v2026_v29 }
 0x131   : > { %v851_v43 = vmul.f32 %v840_v40, %v817_v15 }
 0x132   : > { %v844_v41 = vmul.f32 0.5, %v843_v39  ;;  %v911_v31 = vperm.slane %v905_v30, 0 }
 0x133   : > { %v856_v48 = vmul.f32 %v2190_v44, %v851_v43 }
 0x134   : > { %v845_v42 = vsub.f32 1.5, %v844_v41 }
 0x135   : > { %v861_v51 = vadd.f32 %v2191_v49, %v856_v48 }
 0x136   : > { %v846_v45 = vmul.f32 %v2203_v36, %v845_v42 }
 0x138   : > { %v850_v46 = vsel %vm849_vm8, %v2203_v36, %v846_v45  ;;  %v2027_v36 = vadd.f32 -1.0, %v902_v33 }
 0x139   : > { %v852_v47 = vmul.f32 %v850_v46, %v818_v20 }
 0x13a   : > { %v906_v37 = vmul.f32 1e+30, %v2027_v36 }
 0x13b   : > { %v857_v50 = vmul.f32 %v2190_v44, %v852_v47 }
 0x13c   : > { %v912_v39 = vperm.slane %v906_v37, 0 }
 0x13d   : > { %v862_v52 = vadd.f32 %v2191_v49, %v857_v50 }
 0x13f   : > { %v863_v53 = vpack.c.bf16 %v862_v52, %v861_v51 }
 0x141   : > { %2025 = vmatmul.msk.bf16.vlgmr.msra.gmra.mxu0 %vm801_vm1, %v863_v53 }
 0x1be   : > { %v896_v55 = vpop.f32.mrf.mxu0 }
 0x1bf   : > { %v897_v56 = vadd.f32 %v2192_v54, %v896_v55 }
 0x1c1   : > { %v907_v57 = vpack.c.bf16 %v897_v56, %v897_v56 }
 0x1c3   : > { %v916_v58 = vunpack.c.l.b16 %v907_v57 }
 0x1c5   : > { %v2536_v59 = vpack.c.b16 %v916_v58, %v916_v58 }
 0x1c6   : > { %v898_v60 = vpop.f32.mrf.mxu0 }
 0x1c7   : > { %v899_v61 = vadd.f32 %v2192_v54, %v898_v60  ;;  %1031 = vrot.lane.b32.xlu1 %v2536_v59, %s2308_s30  ;;  %1033 = vrot.lane.b32.xlu0 %v2536_v59, %s2309_s17 }
 0x1c8   : > { %918 = vrot.lane.b32.xlu2 %v2536_v59, %s2310_s2 }
 0x1c9   : > { %v908_v62 = vpack.c.bf16 %v899_v61, %v899_v61 }
 0x1cb   : > { %v941_v63 = vunpack.c.l.b16 %v908_v62 }
 0x1cd   : > { %v2541_v0 = vpack.c.b16 %v941_v63, %v941_v63 }
 0x1cf   : > { %1166 = vrot.lane.b32.xlu1 %v2541_v0, %s2311_s28  ;;  %1168 = vrot.lane.b32.xlu0 %v2541_v0, %s2312_s25 }
 0x1d0   : > { %943 = vrot.lane.b32.xlu2 %v2541_v0, %s2310_s2  ;;  %s2316_s2 = smov 48  }
 0x1d7   : > { %1255 = vrot.lane.b32.xlu1 %v2536_v59, %s2313_s16  ;;  %1257 = vrot.lane.b32.xlu0 %v2536_v59, %s2314_s18 }
 0x1d8   : > { %1056 = vrot.lane.b32.xlu2 %v2541_v0, %s2309_s17 }
 0x1df   : > { %1278 = vrot.lane.b32.xlu0 %v2541_v0, %s2313_s16  ;;  %s2319_s16 = smov 8  }
 0x1e0   : > { %1054 = vrot.lane.b32.xlu2 %v2541_v0, %s2308_s30  ;;  %s2793_s30 = sld [smem:[#allocation15_spill]] (!%p2094_p6) }
 0x1e7   : > { %988 = vrot.lane.b32.xlu0 %v2536_v59, %s2315_s20 }
 0x1e8   : > { %1145 = vrot.lane.b32.xlu2 %v2536_v59, %s2312_s25  ;;  %s2318_s25 = smov 40  }
 0x1f0   : > { %1143 = vrot.lane.b32.xlu2 %v2536_v59, %s2311_s28  ;;  %s2317_s28 = smov 56  }
 0x1f8   : > { %1280 = vrot.lane.b32.xlu2 %v2541_v0, %s2314_s18  ;;  %s2320_s18 = smov 16  }
 0x222   : > { %v919_v1 = vpop.permute.xlu2 %918 }
 0x223   : > { %v925_v3 = vsel %vm920_vm9, %v919_v1, 0 }
 0x224   : > { %934 = vmatpush.bf16.xpose.msra.mxu1 %v925_v3 }
 0x22a   : > { %v944_v5 = vpop.permute.xlu2 %943 }
 0x22b   : > { %2028 = vmatmul.msk.bf16.vlgmr.msra.gmra.mxu1 %vm920_vm9, %v907_v57  ;;  %v949_v6 = vsel %vm920_vm9, %v944_v5, 0 }
 0x22c   : > { %958 = vmatpush.bf16.xpose.msra.mxu2 %v949_v6 }
 0x232   : > { %v1057_v7 = vpop.permute.xlu2 %1056 }
 0x233   : > { %2029 = vmatmul.msk.bf16.vlgmr.msra.gmra.mxu2 %vm920_vm9, %v908_v62  ;;  %v1062_v8 = vsel %vm920_vm9, %v1057_v7, 0 }
 0x234   : > { %1071 = vmatpush.bf16.xpose.msrb.mxu1 %v1062_v8 }
 0x239   : > { %v1034_v9 = vpop.permute.xlu0 %1033  ;;  %v1032_v13 = vpop.permute.xlu1 %1031 }
 0x23a   : > { %v1055_v10 = vpop.permute.xlu2 %1054  ;;  %v1039_v11 = vsel %vm920_vm9, %v1034_v9, 0 }
 0x23b   : > { %2033 = vmatmul.msk.bf16.vlgmr.msrb.gmra.mxu1 %vm920_vm9, %v1055_v10  ;;  %1048 = vmatpush.bf16.xpose.msrb.mxu0 %v1039_v11 }
 0x241   : > { %v1169_v14 = vpop.permute.xlu0 %1168  ;;  %v1167_v19 = vpop.permute.xlu1 %1166 }
 0x242   : > { %v1174_v15 = vsel %vm920_vm9, %v1169_v14, 0  ;;  %v1146_v16 = vpop.permute.xlu2 %1145  ;;  %2032 = vmatmul.msk.bf16.vlgmr.msrb.gmra.mxu0 %vm920_vm9, %v1032_v13 }
 0x243   : > { %v1151_v17 = vsel %vm920_vm9, %v1146_v16, 0  ;;  %1183 = vmatpush.bf16.xpose.msra.mxu1 %v1174_v15 }
 0x244   : > { %1160 = vmatpush.bf16.xpose.msra.mxu0 %v1151_v17 }
 0x249   : > { %v1258_v18 = vpop.permute.xlu0 %1257  ;;  %v1256_v27 = vpop.permute.xlu1 %1255 }
 0x24a   : > { %v1263_v20 = vsel %vm920_vm9, %v1258_v18, 0  ;;  %v1144_v21 = vpop.permute.xlu2 %1143 }
 0x24b   : > { %2037 = vmatmul.msk.bf16.vlgmr.msra.gmra.mxu1 %vm920_vm9, %v1167_v19 }
 0x24c   : > { %1272 = vmatpush.bf16.xpose.msrb.mxu0 %v1263_v20 }
 0x251   : > { %v1279_v22 = vpop.permute.xlu0 %1278 }
 0x252   : > { %v1281_v23 = vpop.permute.xlu2 %1280  ;;  %2036 = vmatmul.msk.bf16.vlgmr.msra.gmra.mxu0 %vm920_vm9, %v1144_v21 }
 0x253   : > { %v1286_v24 = vsel %vm920_vm9, %v1281_v23, 0 }
 0x254   : > { %1295 = vmatpush.bf16.xpose.msrb.mxu1 %v1286_v24 }
 0x259   : > { %v989_v25 = vpop.permute.xlu0 %988 }
 0x25a   : > { %v995_v26 = vsel %vm993_vm10, %v989_v25, 0 }
 0x25b   : > { %2041 = vmatmul.msk.bf16.vlgmr.msrb.gmra.mxu1 %vm920_vm9, %v1279_v22  ;;  %1004 = vmatpush.bf16.msra.mxu3 %v995_v26 }
 0x262   : > { %2040 = vmatmul.msk.bf16.vlgmr.msrb.gmra.mxu0 %vm920_vm9, %v1256_v27 }
 0x2a8   : > { %v936_v32 = vpop.f32.mrf.mxu1 }
 0x2a9   : > { %v937_v34 = vadd.f32 %v936_v32, %v911_v31 }
 0x2ab   : > { %v964_v35 = vsel %vm920_vm9, %v937_v34, -inf }
 0x2ac   : > { %965 = vmax.xlane.f32.xlu2 %v964_v35 }
 0x2b0   : > { %v938_v38 = vpop.f32.mrf.mxu1 }
 0x2b6   : > { %v960_v40 = vpop.f32.mrf.mxu2 }
 0x2b7   : > { %v961_v41 = vadd.f32 %v960_v40, %v912_v39 }
 0x2b8   : > { %v1073_v42 = vpop.f32.mrf.mxu1 }
 0x2b9   : > { %v2580_v43 = vadd.f32 %v1073_v42, %v912_v39  ;;  %v967_v44 = vsel %vm920_vm9, %v961_v41, -inf }
 0x2ba   : > { %968 = vmax.xlane.f32.xlu1 %v967_v44 }
 0x2bb   : > { %v1080_v45 = vsel %vm920_vm9, %v2580_v43, -inf }
 0x2bc   : > { %1081 = vmax.xlane.f32.xlu2 %v1080_v45 }
 0x2be   : > { %v962_v46 = vpop.f32.mrf.mxu2 }
 0x2bf   : > { %v1050_v47 = vpop.f32.mrf.mxu0 }
 0x2c0   : > { %v1051_v48 = vadd.f32 %v1050_v47, %v911_v31  ;;  %v1075_v49 = vpop.f32.mrf.mxu1 }
 0x2c2   : > { %v1077_v50 = vsel %vm920_vm9, %v1051_v48, -inf }
 0x2c3   : > { %1078 = vmax.xlane.f32.xlu0 %v1077_v50 }
 0x2c7   : > { %v1052_v51 = vpop.f32.mrf.mxu0 }
 0x2c8   : > { %v1185_v52 = vpop.f32.mrf.mxu1 }
 0x2c9   : > { %v2586_v53 = vadd.f32 %v1185_v52, %v912_v39 }
 0x2cb   : > { %v1192_v54 = vsel %vm920_vm9, %v2586_v53, -inf }
 0x2cc   : > { %1193 = vmax.xlane.f32.xlu1 %v1192_v54 }
 0x2cf   : > { %v1162_v55 = vpop.f32.mrf.mxu0 }
 0x2d0   : > { %v1163_v56 = vadd.f32 %v1162_v55, %v911_v31  ;;  %v1187_v57 = vpop.f32.mrf.mxu1 }
 0x2d2   : > { %v1189_v58 = vsel %vm920_vm9, %v1163_v56, -inf }
 0x2d3   : > { %1190 = vmax.xlane.f32.xlu2 %v1189_v58 }
 0x2d7   : > { %v1164_v60 = vpop.f32.mrf.mxu0 }
 0x2d8   : > { %v1297_v61 = vpop.f32.mrf.mxu1 }
 0x2d9   : > { %v2591_v62 = vadd.f32 %v1297_v61, %v912_v39 }
 0x2db   : > { %v1304_v63 = vsel %vm920_vm9, %v2591_v62, -inf }
 0x2dc   : > { %1305 = vmax.xlane.f32.xlu0 %v1304_v63 }
 0x2df   : > { %v1274_v1 = vpop.f32.mrf.mxu0 }
 0x2e0   : > { %v1275_v3 = vadd.f32 %v1274_v1, %v911_v31  ;;  %v1299_v5 = vpop.f32.mrf.mxu1 }
 0x2e2   : > { %v1301_v6 = vsel %vm920_vm9, %v1275_v3, -inf }
 0x2e3   : > { %1302 = vmax.xlane.f32.xlu2 %v1301_v6 }
 0x2e7   : > { %v1276_v7 = vpop.f32.mrf.mxu0 }
 0x2f0   : > { %1213 = vrot.lane.b32.xlu0 %v2536_v59, %s2316_s2 }
 0x2fb   : > { %1101 = vrot.lane.b32.xlu2 %v2536_v59, %s2317_s28 }
 0x31f   : > { %v966_v8 = vpop.xlane.xlu2 %965 }
 0x320   : > { %v970_v9 = vsub.f32 %v937_v34, %v966_v8 }
 0x322   : > { %v972_v10 = vmul.f32 1.442695, %v970_v9 }
 0x324   : > { %2204 = vpow2.f32 %v972_v10 }
 0x32a   : > { %v2205_v11 = vpop.eup %2204 }
 0x32b   : > { %v976_v13 = vsel %vm920_vm9, %v2205_v11, 0.0 }
 0x32c   : > { %977 = vadd.xlane.f32.xlu1 %v976_v13 }
 0x32d   : > { %v969_v14 = vpop.xlane.xlu1 %968 }
 0x32e   : > { %v971_v17 = vsub.f32 %v961_v41, %v969_v14 }
 0x32f   : > { %v1082_v20 = vpop.xlane.xlu2 %1081 }
 0x330   : > { %v974_v19 = vmul.f32 1.442695, %v971_v17  ;;  %v1084_v34 = vsub.f32 %v2580_v43, %v1082_v20 }
 0x332   : > { %v1087_v36 = vmul.f32 1.442695, %v1084_v34 }
 0x336   : > { %v1079_v15 = vpop.xlane.xlu0 %1078 }
 0x337   : > { %v1083_v16 = vsub.f32 %v1051_v48, %v1079_v15 }
 0x339   : > { %v1085_v18 = vmul.f32 1.442695, %v1083_v16 }
 0x33b   : > { %2206 = vpow2.f32 %v1085_v18 }
 0x33c   : > { %2208 = vpow2.f32 %v974_v19 }
 0x33f   : > { %v1194_v42 = vpop.xlane.xlu1 %1193 }
 0x340   : > { %v1196_v43 = vsub.f32 %v2586_v53, %v1194_v42 }
 0x341   : > { %v2601_v21 = vpop.eup %2206 }
 0x342   : > { %v1089_v22 = vsel %vm920_vm9, %v2601_v21, 0.0  ;;  %v2209_v24 = vpop.eup %2208  ;;  %v1199_v44 = vmul.f32 1.442695, %v1196_v43 }
 0x343   : > { %1090 = vadd.xlane.f32.xlu2 %v1089_v22  ;;  %v979_v27 = vsel %vm920_vm9, %v2209_v24, 0.0 }
 0x345   : > { %1010 = vrot.lane.b32.xlu1 %v2541_v0, %s2315_s20  ;;  %s2321_s20 = smov 24  }
 0x346   : > { %v1191_v23 = vpop.xlane.xlu2 %1190 }
 0x347   : > { %v1195_v25 = vsub.f32 %v1163_v56, %v1191_v23 }
 0x349   : > { %v1197_v26 = vmul.f32 1.442695, %v1195_v25 }
 0x34b   : > { %2210 = vpow2.f32 %v1197_v26  ;;  %980 = vadd.xlane.f32.xlu2 %v979_v27 }
 0x34f   : > { %v1306_v33 = vpop.xlane.xlu0 %1305 }
 0x350   : > { %v1308_v48 = vsub.f32 %v2591_v62, %v1306_v33 }
 0x351   : > { %v2608_v28 = vpop.eup %2210 }
 0x352   : > { %v1201_v29 = vsel %vm920_vm9, %v2608_v28, 0.0  ;;  %v1311_v49 = vmul.f32 1.442695, %v1308_v48 }
 0x353   : > { %1202 = vadd.xlane.f32.xlu0 %v1201_v29 }
 0x356   : > { %v1303_v30 = vpop.xlane.xlu2 %1302 }
 0x357   : > { %v1307_v31 = vsub.f32 %v1275_v3, %v1303_v30 }
 0x359   : > { %v1309_v32 = vmul.f32 1.442695, %v1307_v31 }
 0x35b   : > { %2212 = vpow2.f32 %v1309_v32 }
 0x35c   : > { %2214 = vpow2.f32 %v1087_v36 }
 0x35d   : > { %2216 = vpow2.f32 %v1199_v44 }
 0x35e   : > { %v1102_v54 = vpop.permute.xlu2 %1101 }
 0x35f   : > { %v1107_v58 = vsel %vm993_vm10, %v1102_v54, 0  ;;  %v2114_v54 = vld [vmem:[%s2460_s26] sm:$0xff] }
 0x361   : > { %v2613_v35 = vpop.eup %2212 }
 0x362   : > { %v1214_v37 = vpop.permute.xlu0 %1213  ;;  %v1313_v38 = vsel %vm920_vm9, %v2613_v35, 0.0  ;;  %v2215_v40 = vpop.eup %2214 }
 0x363   : > { %1122 = vrot.lane.b32.xlu2 %v2541_v0, %s2317_s28  ;;  %v1219_v39 = vsel %vm993_vm10, %v1214_v37, 0  ;;  %1314 = vadd.xlane.f32.xlu0 %v1313_v38  ;;  %v1092_v41 = vsel %vm920_vm9, %v2215_v40, 0.0  ;;  %v2623_v45 = vpop.eup %2216 }
 0x364   : > { %1228 = vmatpush.bf16.msrb.mxu2 %v1219_v39  ;;  %v1204_v46 = vsel %vm920_vm9, %v2623_v45, 0.0 }
 0x36f   : > { %1093 = vadd.xlane.f32.xlu1 %v1092_v41 }
 0x377   : > { %1346 = vrot.lane.b32.xlu0 %v2541_v0, %s2318_s25 }
 0x388   : > { %1234 = vrot.lane.b32.xlu1 %v2541_v0, %s2316_s2 }
 0x38c   : > { %1205 = vadd.xlane.f32.xlu2 %v1204_v46 }
 0x39f   : > { %v978_v47 = vpop.xlane.xlu1 %977 }
 0x3a0   : > { %2218 = vrcp.f32 %v978_v47 }
 0x3a1   : > { %2220 = vpow2.f32 %v1311_v49 }
 0x3a4   : > { %1325 = vrot.lane.b32.xlu2 %v2536_v59, %s2318_s25 }
 0x3a6   : > { %v2219_v50 = vpop.eup %2218 }
 0x3a7   : > { %v984_v51 = vmul.f32 %v2219_v50, %v2205_v11  ;;  %v2221_v53 = vpop.eup %2220 }
 0x3a8   : > { %v1316_v0 = vsel %vm920_vm9, %v2221_v53, 0.0 }
 0x3a9   : > { %v986_v52 = vpack.c.bf16 %v984_v51, %v984_v51 }
 0x3ab   : > { %2030 = vmatmul.msk.bf16.vlgmr.msra.gmra.mxu3 %vm920_vm9, %v986_v52 }
 0x3b2   : > { %1317 = vadd.xlane.f32.xlu1 %v1316_v0 }
 0x3b6   : > { %v1091_v55 = vpop.xlane.xlu2 %1090 }
 0x3b7   : > { %v1011_v56 = vpop.permute.xlu1 %1010 }
 0x3b8   : > { %v1016_v57 = vsel %vm993_vm10, %v1011_v56, 0 }
 0x3b9   : > { %1025 = vmatpush.bf16.msrb.mxu3 %v1016_v57 }
 0x3bd   : > { %1116 = vmatpush.bf16.msra.mxu3 %v1107_v58 }
 0x3be   : > { %v981_v59 = vpop.xlane.xlu2 %980 }
 0x3bf   : > { %2222 = vrcp.f32 %v981_v59 }
 0x3c5   : > { %v2223_v60 = vpop.eup %2222 }
 0x3c6   : > { %v985_v61 = vmul.f32 %v2223_v60, %v2209_v24  ;;  %v1203_v62 = vpop.xlane.xlu0 %1202  ;;  %v1123_v63 = vpop.permute.xlu2 %1122 }
 0x3c7   : > { %2224 = vrcp.f32 %v1203_v62  ;;  %v1128_v3 = vsel %vm993_vm10, %v1123_v63, 0 }
 0x3c8   : > { %v987_v1 = vpack.c.bf16 %v985_v61, %v985_v61  ;;  %2226 = vrcp.f32 %v1091_v55 }
 0x3ca   : > { %2031 = vmatmul.msk.bf16.vlgmr.msrb.gmra.mxu3 %vm920_vm9, %v987_v1 }
 0x3cb   : > { %1137 = vmatpush.bf16.msrb.mxu3 %v1128_v3 }
 0x3cd   : > { %v2225_v5 = vpop.eup %2224 }
 0x3ce   : > { %v1209_v6 = vmul.f32 %v2225_v5, %v2608_v28  ;;  %v2227_v8 = vpop.eup %2226 }
 0x3cf   : > { %v1097_v9 = vmul.f32 %v2227_v8, %v2601_v21 }
 0x3d0   : > { %v1211_v7 = vpack.c.bf16 %v1209_v6, %v1209_v6 }
 0x3d1   : > { %v1099_v10 = vpack.c.bf16 %v1097_v9, %v1097_v9  ;;  %v2193_v9 = vld [vmem:[%s2790_s23] ss:$0 sm:$0xff] }
 0x3d2   : > { %2038 = vmatmul.msk.bf16.vlgmr.msrb.gmra.mxu2 %vm920_vm9, %v1211_v7 }
 0x3d6   : > { %v1315_v16 = vpop.xlane.xlu0 %1314 }
 0x3da   : > { %2034 = vmatmul.msk.bf16.vlgmr.msra.gmra.mxu3 %vm920_vm9, %v1099_v10 }
 0x3e2   : > { %v1094_v11 = vpop.xlane.xlu1 %1093 }
 0x3e3   : > { %2228 = vrcp.f32 %v1094_v11 }
 0x3e4   : > { %2230 = vrcp.f32 %v1315_v16 }
 0x3e9   : > { %v2229_v13 = vpop.eup %2228  ;;  %v1347_v17 = vpop.permute.xlu0 %1346 }
 0x3ea   : > { %v1098_v14 = vmul.f32 %v2229_v13, %v2215_v40  ;;  %v1352_v20 = vsel %vm993_vm10, %v1347_v17, 0  ;;  %v2231_v22 = vpop.eup %2230 }
 0x3eb   : > { %v1321_v24 = vmul.f32 %v2231_v22, %v2613_v35 }
 0x3ec   : > { %v1100_v15 = vpack.c.bf16 %v1098_v14, %v1098_v14 }
 0x3ed   : > { %v1323_v29 = vpack.c.bf16 %v1321_v24, %v1321_v24 }
 0x3ee   : > { %2035 = vmatmul.msk.bf16.vlgmr.msrb.gmra.mxu3 %vm920_vm9, %v1100_v15 }
 0x3fa   : > { %v1235_v18 = vpop.permute.xlu1 %1234 }
 0x3fb   : > { %v1240_v19 = vsel %vm993_vm10, %v1235_v18, 0 }
 0x3fc   : > { %1249 = vmatpush.bf16.msra.mxu3 %v1240_v19 }
 0x3ff   : > { %v1206_v21 = vpop.xlane.xlu2 %1205 }
 0x400   : > { %1361 = vmatpush.bf16.msrb.mxu3 %v1352_v20  ;;  %2232 = vrcp.f32 %v1206_v21 }
 0x406   : > { %v2233_v23 = vpop.eup %2232 }
 0x407   : > { %v1210_v25 = vmul.f32 %v2233_v23, %v2623_v45  ;;  %v1326_v26 = vpop.permute.xlu2 %1325 }
 0x408   : > { %v1331_v27 = vsel %vm993_vm10, %v1326_v26, 0 }
 0x409   : > { %v1212_v28 = vpack.c.bf16 %v1210_v25, %v1210_v25  ;;  %1340 = vmatpush.bf16.msra.mxu2 %v1331_v27  ;;  %v2117_v27 = vld [vmem:[%s2477_s5 + $0x8] sm:$0xff] }
 0x40a   : > { %1525 = vmatpush.bf16.msra.mxu1 %v2117_v27 }
 0x40b   : > { %2039 = vmatmul.msk.bf16.vlgmr.msra.gmra.mxu3 %vm920_vm9, %v1212_v28 }
 0x40c   : > { %2042 = vmatmul.msk.bf16.vlgmr.msra.gmra.mxu2 %vm920_vm9, %v1323_v29 }
 0x425   : > { %v1318_v30 = vpop.xlane.xlu1 %1317 }
 0x426   : > { %2234 = vrcp.f32 %v1318_v30  ;;  %v2116_v30 = vld [vmem:[%s2477_s5] sm:$0xff] }
 0x427   : > { %1526 = vmatpush.bf16.msra.mxu1 %v2116_v30 }
 0x42c   : > { %v2235_v31 = vpop.eup %2234 }
 0x42d   : > { %v1322_v32 = vmul.f32 %v2235_v31, %v2221_v53  ;;  %v2115_v53 = vld [vmem:[%s2460_s26 + $0x8] sm:$0xff] }
 0x42e   : > { %v1006_v33 = vpop.f32.mrf.mxu3  ;;  %1429 = vmatpush.bf16.msra.mxu0 %v2115_v53 }
 0x42f   : > { %v1324_v34 = vpack.c.bf16 %v1322_v32, %v1322_v32  ;;  %v2125_v32 = vld [vmem:[%s2487_s19 + $0x38] sm:$0xff] }
 0x430   : > { %1604 = vmatpush.bf16.msrb.mxu2 %v2125_v32 }
 0x431   : > { %2043 = vmatmul.msk.bf16.vlgmr.msrb.gmra.mxu3 %vm920_vm9, %v1324_v34 }
 0x432   : > { %1430 = vmatpush.bf16.msra.mxu0 %v2114_v54  ;;  %v2195_v54 = vld [vmem:[%s770_s27] ss:$0 sm:$0xff] }
 0x436   : > { %v1008_v35 = vpop.f32.mrf.mxu3 }
 0x437   : > { %v2124_v35 = vld [vmem:[%s2487_s19 + $0x30] sm:$0xff] }
 0x438   : > { %1605 = vmatpush.bf16.msrb.mxu2 %v2124_v35 }
 0x44d   : > { %v1027_v36 = vpop.f32.mrf.mxu3 }
 0x455   : > { %v1029_v37 = vpop.f32.mrf.mxu3  ;;  %v1230_v38 = vpop.f32.mrf.mxu2 }
 0x45d   : > { %v1118_v39 = vpop.f32.mrf.mxu3  ;;  %v1232_v40 = vpop.f32.mrf.mxu2 }
 0x465   : > { %v1120_v41 = vpop.f32.mrf.mxu3 }
 0x471   : > { %v1139_v42 = vpop.f32.mrf.mxu3 }
 0x472   : > { %v2175_v43 = vpack.i.bf16 %v1139_v42, %v1118_v39  ;;  %v2123_v39 = vld [vmem:[%s2487_s19 + $0x28] sm:$0xff]  ;;  %v2122_v42 = vld [vmem:[%s2487_s19 + $0x20] sm:$0xff] }
 0x473   : > { %1606 = vmatpush.bf16.msrb.mxu2 %v2123_v39 }
 0x474   : > { %2176 = vrot.lane.b32.xlu2 %v2175_v43, %s2319_s16  ;;  %s2791_s16 = sld [smem:[#allocation11_spill]] (!%p2094_p6) }
 0x477   : > { %1607 = vmatpush.bf16.msrb.mxu2 %v2122_v42 }
 0x479   : > { %v1141_v44 = vpop.f32.mrf.mxu3 }
 0x48e   : > { %v1251_v45 = vpop.f32.mrf.mxu3 }
 0x48f   : > { %v2180_v46 = vpack.i.bf16 %v1251_v45, %v1230_v38  ;;  %v1342_v47 = vpop.f32.mrf.mxu2 }
 0x491   : > { %2181 = vrot.lane.b32.xlu2 %v2180_v46, %s2320_s18 }
 0x496   : > { %v1253_v48 = vpop.f32.mrf.mxu3 }
 0x497   : > { %v1344_v49 = vpop.f32.mrf.mxu2 }
 0x4b4   : > { %v1363_v50 = vpop.f32.mrf.mxu3 }
 0x4b5   : > { %v2185_v51 = vpack.i.bf16 %v1363_v50, %v1342_v47  ;;  %v2194_v50 = vld [vmem:[%s767_s15] ss:$0 sm:$0xff] }
 0x4b7   : > { %2186 = vrot.lane.b32.xlu1 %v2185_v51, %s2321_s20  ;;  %s2792_s20 = sld [smem:[#allocation14_spill]] (!%p2094_p6) }
 0x4bc   : > { %v1365_v52 = vpop.f32.mrf.mxu3 }
 0x4ce   : > { %v2177_v0 = vpop.permute.xlu2 %2176 }
 0x4cf   : > { %v2179_v56 = vunpack.i.h.bf16 %v2177_v0  ;;  %v2178_v57 = vunpack.i.l.bf16 %v2177_v0 }
 0x4d1   : > { %v1392_v61 = vsel %vm920_vm9, %v1027_v36, %v2179_v56  ;;  %v1391_v62 = vsel %vm920_vm9, %v1006_v33, %v2178_v57 }
 0x4eb   : > { %v2182_v55 = vpop.permute.xlu2 %2181 }
 0x4ec   : > { %v2184_v58 = vunpack.i.h.bf16 %v2182_v55  ;;  %v2183_v59 = vunpack.i.l.bf16 %v2182_v55 }
 0x4ee   : > { %v1394_v3 = vsel %vm1393_vm11, %v1391_v62, %v2183_v59  ;;  %v1395_v5 = vsel %vm1393_vm11, %v1392_v61, %v2184_v58  ;;  %v2120_v61 = vld [vmem:[%s2487_s19 + $0x10] sm:$0xff]  ;;  %v2119_v62 = vld [vmem:[%s2487_s19 + $0x8] sm:$0xff] }
 0x529   : > { %v2187_v60 = vpop.permute.xlu1 %2186 }
 0x52a   : > { %v2189_v63 = vunpack.i.h.bf16 %v2187_v60  ;;  %v2188_v1 = vunpack.i.l.bf16 %v2187_v60  ;;  %v2121_v60 = vld [vmem:[%s2487_s19 + $0x18] sm:$0xff] }
 0x52b   : > { %1608 = vmatpush.bf16.msrb.mxu2 %v2121_v60 }
 0x52c   : > { %v1397_v6 = vsel %vm1396_vm12, %v1394_v3, %v2188_v1  ;;  %v1398_v7 = vsel %vm1396_vm12, %v1395_v5, %v2189_v63  ;;  %v2118_v63 = vld [vmem:[%s2487_s19] sm:$0xff] }
 0x52d   : > { %v1399_v8 = vpack.c.bf16 %v1398_v7, %v1397_v6  ;;  %v2196_v3 = vld [vmem:[%s778_s7] ss:$0 sm:$0xff] }
 0x52f   : > { %2052 = vmatmul.msk.bf16.vlgmr.msra.gmra.mxu0 %vm801_vm1, %v1399_v8  ;;  %1609 = vmatpush.bf16.msrb.mxu2 %v2120_v61 }
 0x533   : > { %1610 = vmatpush.bf16.msrb.mxu2 %v2119_v62 }
 0x537   : > { %1611 = vmatpush.bf16.msrb.mxu2 %v2118_v63 }
 0x5ac   : > { %v1432_v10 = vpop.f32.mrf.mxu0 }
 0x5ad   : > { %v1433_v11 = vadd.f32 %v2193_v9, %v1432_v10 }
 0x5af   : > { %v2661_v13 = vadd.f32 %v1433_v11, %v2500_v2  ;;  %v2197_v11 = vld [vmem:[%s786_s22] ss:$0 sm:$0xff] }
 0x5b1   : > { %v1441_v14 = vsel %vm801_vm1, %v2661_v13, 0.0 }
 0x5b2   : > { %1442 = vadd.xlane.f32.xlu2 %v1441_v14 }
 0x5b4   : > { %v1434_v15 = vpop.f32.mrf.mxu0 }
 0x5b5   : > { %v1435_v16 = vadd.f32 %v2193_v9, %v1434_v15 }
 0x5b7   : > { %v2666_v17 = vadd.f32 %v1435_v16, %v2504_v4 }
 0x5b9   : > { %v1444_v18 = vsel %vm801_vm1, %v2666_v17, 0.0 }
 0x5ba   : > { %1445 = vadd.xlane.f32.xlu0 %v1444_v18 }
 0x625   : > { %v1443_v19 = vpop.xlane.xlu2 %1442 }
 0x626   : > { %v1447_v20 = vmul.f32 %v1443_v19, %v2508_v12 }
 0x628   : > { %v1449_v2 = vsub.f32 %v2661_v13, %v1447_v20 }
 0x62a   : > { %v1451_v21 = vmul.f32 %v1449_v2, %v1449_v2 }
 0x62c   : > { %v1453_v22 = vsel %vm801_vm1, %v1451_v21, 0.0 }
 0x62d   : > { %v1446_v23 = vpop.xlane.xlu0 %1445  ;;  %1454 = vadd.xlane.f32.xlu1 %v1453_v22 }
 0x62e   : > { %v1448_v24 = vmul.f32 %v1446_v23, %v2508_v12 }
 0x630   : > { %v1450_v4 = vsub.f32 %v2666_v17, %v1448_v24 }
 0x632   : > { %v1452_v25 = vmul.f32 %v1450_v4, %v1450_v4 }
 0x634   : > { %v1456_v26 = vsel %vm801_vm1, %v1452_v25, 0.0 }
 0x635   : > { %1457 = vadd.xlane.f32.xlu2 %v1456_v26 }
 0x6a0   : > { %v1455_v28 = vpop.xlane.xlu1 %1454 }
 0x6a1   : > { %v1459_v29 = vmul.f32 %v1455_v28, %v2508_v12 }
 0x6a3   : > { %v1461_v31 = vadd.f32 1e-05, %v1459_v29 }
 0x6a5   : > { %2236 = vrsqrt.f32 %v1461_v31  ;;  %vm1469_vm14 = vweird.f32 %v1461_v31 }
 0x6a8   : > { %v1458_v33 = vpop.xlane.xlu2 %1457 }
 0x6a9   : > { %v1460_v34 = vmul.f32 %v1458_v33, %v2508_v12 }
 0x6ab   : > { %v2237_v36 = vpop.eup %2236  ;;  %v1462_v37 = vadd.f32 1e-05, %v1460_v34 }
 0x6ac   : > { %v1464_v38 = vmul.f32 %v2237_v36, %v1461_v31  ;;  %vm1470_vm13 = vweird.f32 %v2237_v36 }
 0x6ad   : > { %2238 = vrsqrt.f32 %v1462_v37  ;;  %vm1471_vm15 = vmor %vm1469_vm14, %vm1470_vm13  ;;  %vm1479_vm2 = vweird.f32 %v1462_v37 }
 0x6ae   : > { %v1465_v40 = vmul.f32 %v2237_v36, %v1464_v38 }
 0x6b0   : > { %v1466_v41 = vmul.f32 0.5, %v1465_v40 }
 0x6b2   : > { %v1467_v43 = vsub.f32 1.5, %v1466_v41 }
 0x6b3   : > { %v2239_v44 = vpop.eup %2238 }
 0x6b4   : > { %v1468_v45 = vmul.f32 %v2237_v36, %v1467_v43  ;;  %v1474_v46 = vmul.f32 %v2239_v44, %v1462_v37  ;;  %vm1480_vm0 = vweird.f32 %v2239_v44 }
 0x6b5   : > { %vm1481_vm3 = vmor %vm1479_vm2, %vm1480_vm0 }
 0x6b6   : > { %v1475_v12 = vmul.f32 %v2239_v44, %v1474_v46  ;;  %v1472_v47 = vsel %vm1471_vm15, %v2237_v36, %v1468_v45 }
 0x6b7   : > { %v1483_v51 = vmul.f32 %v1472_v47, %v1449_v2 }
 0x6b8   : > { %v1476_v48 = vmul.f32 0.5, %v1475_v12 }
 0x6b9   : > { %v1488_v0 = vmul.f32 %v2194_v50, %v1483_v51 }
 0x6ba   : > { %v1477_v49 = vsub.f32 1.5, %v1476_v48 }
 0x6bb   : > { %v1493_v57 = vadd.f32 %v2195_v54, %v1488_v0 }
 0x6bc   : > { %v1478_v52 = vmul.f32 %v2239_v44, %v1477_v49 }
 0x6be   : > { %v1482_v53 = vsel %vm1481_vm3, %v2239_v44, %v1478_v52 }
 0x6bf   : > { %v1484_v55 = vmul.f32 %v1482_v53, %v1450_v4 }
 0x6c1   : > { %v1489_v56 = vmul.f32 %v2194_v50, %v1484_v55 }
 0x6c3   : > { %v1494_v58 = vadd.f32 %v2195_v54, %v1489_v56 }
 0x6c5   : > { %v1495_v59 = vpack.c.bf16 %v1494_v58, %v1493_v57 }
 0x6c7   : > { %2061 = vmatmul.msk.bf16.vlgmr.msra.gmra.mxu1 %vm801_vm1, %v1495_v59 }
 0x744   : > { %v1528_v1 = vpop.f32.mrf.mxu1 }
 0x745   : > { %v1529_v5 = vadd.f32 %v2196_v3, %v1528_v1 }
 0x747   : > { %v1533_v8 = vmax.f32 %v1529_v5, 0.0 }
 0x74c   : > { %v1530_v6 = vpop.f32.mrf.mxu1 }
 0x74d   : > { %v1531_v7 = vadd.f32 %v2196_v3, %v1530_v6 }
 0x74f   : > { %v1534_v9 = vmax.f32 %v1531_v7, 0.0 }
 0x751   : > { %v1535_v10 = vpack.c.bf16 %v1534_v9, %v1533_v8 }
 0x753   : > { %1612 = vmatmul.bf16.vlgmr.msrb.gmra.mxu2 %v1535_v10 }
 0x7d6   : > { %v1613_v14 = vpop.f32.mrf.mxu2 }
 0x7d7   : > { %v1614_v15 = vadd.f32 %v2197_v11, %v1613_v14 }
 0x7d9   : > { %v1618_v16 = vadd.f32 %v1614_v15, %v2661_v13 }
 0x7db   : > { %1620 = vst.msk [vmem:[#allocation2] sm:$0xff] %vm801_vm1, %v1618_v16 }
 0x7de   : > { %v1615_v18 = vpop.f32.mrf.mxu2 }
 0x7df   : > { %v1616_v19 = vadd.f32 %v2197_v11, %v1615_v18  ;;  %1625 = sbr.rel (%p2094_p6) target bundleno = 2475 (0x9ab), region = 96 }
 0x7e1   : > { %v1619_v20 = vadd.f32 %v1616_v19, %v2666_v17 }
 0x7e3   : > { %1621 = vst.msk [vmem:[#allocation2 + $0x8] sm:$0xff] %vm801_vm1, %v1619_v20 }
 0x7e4   : > { %v1626_v2 = vld [vmem:[%s2791_s16] sm:$0xff]  ;;  %vm1654_vm4 = vcmask 7168   ;;  %v1627_v13 = vld [vmem:[%s2791_s16 + $0x8] sm:$0xff]  ;;  %v2322_v21 = vmov 0   ;;  %vm1725_vm13 = vcmask 1041409   ;;  %vm1757_vm14 = vcmask 254976  }
 0x7e5   : > { %2241 = vset.pattern.permute.xlu1 %v2322_v21  ;;  %v1655_v22 = vsel %vm1654_vm4, %v1626_v2, 0.0  ;;  %v1662_v23 = vsel %vm1654_vm4, %v1627_v13, 0.0  ;;  %2240 = vset.pattern.permute.xlu0 %v2322_v21  ;;  %v2127_v38 = vld [vmem:[%s2792_s20 + $0x8] sm:$0xff]  ;;  %v2126_v40 = vld [vmem:[%s2792_s20] sm:$0xff] }
 0x7e6   : > { %1630 = vperm.xlu1 %2241, %v1626_v2   ;;  %v1656_v17 = vrot.slane %v1655_v22, 4  ;;  %v1663_v24 = vrot.slane %v1662_v23, 4  ;;  %1749 = vmatpush.bf16.msra.mxu0 %v2127_v38 }
 0x7e8   : > { %v1657_v4 = vadd.f32 %v1656_v17, %v1655_v22  ;;  %v1664_v25 = vadd.f32 %v1663_v24, %v1662_v23  ;;  %v2242_v17 = vld [vmem:[%s2793_s30] ss:$0 sm:$0xff] }
 0x7ea   : > { %v1658_v26 = vrot.slane %v1657_v4, 2  ;;  %v1665_v27 = vrot.slane %v1664_v25, 2  ;;  %1750 = vmatpush.bf16.msra.mxu0 %v2126_v40 }
 0x7ec   : > { %v1666_v28 = vadd.f32 %v1665_v27, %v1664_v25  ;;  %v1659_v29 = vadd.f32 %v1658_v26, %v1657_v4 }
 0x7ee   : > { %1635 = vperm.xlu1 %2241, %v1627_v13   ;;  %v1660_v30 = vrot.slane %v1659_v29, 1  ;;  %v1667_v32 = vrot.slane %v1666_v28, 1 }
 0x7f0   : > { %v1661_v31 = vadd.f32 %v1660_v30, %v1659_v29  ;;  %v1668_v34 = vadd.f32 %v1667_v32, %v1666_v28 }
 0x7f2   : > { %v1669_v33 = vmax.f32 %v1661_v31, 1.0  ;;  %v1670_v35 = vmax.f32 %v1668_v34, 1.0 }
 0x7f4   : > { %1673 = vperm.xlu0 %2240, %v1669_v33  }
 0x7fc   : > { %1678 = vperm.xlu0 %2240, %v1670_v35  }
 0x858   : > { %v1631_v36 = vpop.permute.xlu1 %1630 }
 0x859   : > { %v1638_v37 = vmul.f32 %v1631_v36, %v1618_v16 }
 0x85b   : > { %v1640_v41 = vsel %vm801_vm1, %v1638_v37, 0.0 }
 0x85c   : > { %v1641_v43 = vrot.slane %v1640_v41, 4 }
 0x85e   : > { %v1642_v46 = vadd.f32 %v1641_v43, %v1640_v41 }
 0x860   : > { %v1636_v39 = vpop.permute.xlu1 %1635  ;;  %v1643_v48 = vrot.slane %v1642_v46, 2 }
 0x861   : > { %v1639_v42 = vmul.f32 %v1636_v39, %v1619_v20 }
 0x862   : > { %v1644_v53 = vadd.f32 %v1643_v48, %v1642_v46 }
 0x863   : > { %v1647_v45 = vsel %vm801_vm1, %v1639_v42, 0.0 }
 0x864   : > { %v1648_v12 = vrot.slane %v1647_v45, 4  ;;  %v1645_v59 = vrot.slane %v1644_v53, 1 }
 0x866   : > { %v1674_v44 = vpop.permute.xlu0 %1673  ;;  %v1649_v49 = vadd.f32 %v1648_v12, %v1647_v45  ;;  %v1646_v3 = vadd.f32 %v1645_v59, %v1644_v53 }
 0x867   : > { %2243 = vrcp.f32 %v1674_v44  ;;  %v1692_v55 = vand.u32 2147483648, %v1674_v44  ;;  %vm1686_vm6 = vweird.f32 %v1674_v44  ;;  %v1690_v57 = vand.u32 2147483647, %v1674_v44 }
 0x868   : > { %v1650_v54 = vrot.slane %v1649_v49, 2 }
 0x869   : > { %v1693_v63 = vor.u32 1.1754944e-38, %v1692_v55  ;;  %vm1691_vm8 = vcmp.eq.f32.partialorder %v1690_v57, 8.507059e+37 }
 0x86a   : > { %v1651_v60 = vadd.f32 %v1650_v54, %v1649_v49 }
 0x86c   : > { %v1652_v7 = vrot.slane %v1651_v60, 1 }
 0x86d   : > { %v2244_v47 = vpop.eup %2243 }
 0x86e   : > { %v1682_v50 = vmul.f32 %v2244_v47, %v1674_v44  ;;  %v1679_v51 = vpop.permute.xlu0 %1678  ;;  %vm1687_vm5 = vweird.f32 %v2244_v47  ;;  %v1653_v15 = vadd.f32 %v1652_v7, %v1651_v60 }
 0x86f   : > { %2245 = vrcp.f32 %v1679_v51  ;;  %vm1688_vm7 = vmor %vm1686_vm6, %vm1687_vm5  ;;  %v1707_v5 = vand.u32 2147483648, %v1679_v51  ;;  %v1705_v9 = vand.u32 2147483647, %v1679_v51  ;;  %vm1701_vm10 = vweird.f32 %v1679_v51 }
 0x870   : > { %v1683_v52 = vsub.f32 1.0, %v1682_v50 }
 0x871   : > { %v1708_v14 = vor.u32 1.1754944e-38, %v1707_v5  ;;  %vm1706_vm12 = vcmp.eq.f32.partialorder %v1705_v9, 8.507059e+37 }
 0x872   : > { %v1684_v0 = vmul.f32 %v2244_v47, %v1683_v52 }
 0x874   : > { %v1685_v56 = vadd.f32 %v2244_v47, %v1684_v0 }
 0x875   : > { %v2246_v58 = vpop.eup %2245 }
 0x876   : > { %v1697_v61 = vmul.f32 %v2246_v58, %v1679_v51  ;;  %v1689_v62 = vsel %vm1688_vm7, %v2244_v47, %v1685_v56  ;;  %vm1702_vm9 = vweird.f32 %v2246_v58 }
 0x877   : > { %v1694_v6 = vsel %vm1691_vm8, %v1693_v63, %v1689_v62  ;;  %vm1703_vm11 = vmor %vm1701_vm10, %vm1702_vm9 }
 0x878   : > { %v1698_v1 = vsub.f32 1.0, %v1697_v61  ;;  %v1695_v11 = vmul.f32 %v1694_v6, %v1646_v3 }
 0x87a   : > { %v1699_v8 = vmul.f32 %v2246_v58, %v1698_v1  ;;  %v1711_v20 = vpack.c.bf16 %v1695_v11, %v1695_v11 }
 0x87c   : > { %v1700_v10 = vadd.f32 %v2246_v58, %v1699_v8  ;;  %v1723_v13 = vunpack.c.l.b16 %v1711_v20 }
 0x87e   : > { %v1704_v16 = vsel %vm1703_vm11, %v2246_v58, %v1700_v10 }
 0x87f   : > { %v1709_v18 = vsel %vm1706_vm12, %v1708_v14, %v1704_v16 }
 0x880   : > { %v1710_v19 = vmul.f32 %v1709_v18, %v1653_v15 }
 0x882   : > { %v1712_v2 = vpack.c.bf16 %v1710_v19, %v1710_v19 }
 0x884   : > { %v1724_v21 = vunpack.c.l.b16 %v1712_v2 }
 0x886   : > { %v1726_v22 = vsel %vm1725_vm13, %v1724_v21, %v1723_v13 }
 0x887   : > { %v1727_v23 = vpack.c.b16 %v1726_v22, %v1726_v22 }
 0x889   : > { %2103 = vmatmul.msk.bf16.vlgmr.msra.gmra.mxu0 %vm801_vm1, %v1727_v23 }
 0x906   : > { %v1752_v24 = vpop.f32.mrf.mxu0 }
 0x907   : > { %v1753_v4 = vadd.f32 %v2242_v17, %v1752_v24 }
 0x909   : > { %v1756_v25 = vmul.f32 %v1753_v4, %v1753_v4 }
 0x90b   : > { %v1758_v26 = vsel %vm1757_vm14, %v1756_v25, 0.0 }
 0x90c   : > { %1759 = vadd.xlane.f32.xlu2 %v1758_v26 }
 0x90e   : > { %v1754_v27 = vpop.f32.mrf.mxu0 }
 0x97f   : > { %v1760_v28 = vpop.xlane.xlu2 %1759 }
 0x980   : > { %2247 = vrsqrt.f32 %v1760_v28  ;;  %vm1768_vm1 = vcmp.eq.f32.partialorder %v1760_v28, inf  ;;  %v1771_v36 = vand.u32 2147483648, %v1760_v28  ;;  %vm1770_vm15 = vcmp.eq.f32.partialorder %v1760_v28, 0.0 }
 0x986   : > { %v2248_v29 = vpop.eup %2247 }
 0x987   : > { %v1762_v30 = vmul.f32 %v2248_v29, %v1760_v28 }
 0x989   : > { %v1763_v31 = vmul.f32 %v2248_v29, %v1762_v30 }
 0x98b   : > { %v1764_v32 = vmul.f32 0.5, %v1763_v31 }
 0x98d   : > { %v1765_v33 = vsub.f32 1.5, %v1764_v32 }
 0x98f   : > { %v1766_v34 = vmul.f32 %v2248_v29, %v1765_v33 }
 0x991   : > { %v1767_v35 = vmul.f32 %v1766_v34, %v1760_v28 }
 0x993   : > { %v1769_v37 = vsel %vm1768_vm1, %v1760_v28, %v1767_v35 }
 0x994   : > { %v1772_v38 = vsel %vm1770_vm15, %v1771_v36, %v1769_v37 }
 0x995   : > { %v1773_v39 = vmax.f32 %v1772_v38, 1e-12 }
 0x997   : > { %2249 = vrcp.f32 %v1773_v39  ;;  %v1785_v43 = vand.u32 2147483648, %v1773_v39  ;;  %v1783_v45 = vand.u32 2147483647, %v1773_v39  ;;  %vm1779_vm2 = vweird.f32 %v1773_v39 }
 0x999   : > { %v1786_v12 = vor.u32 1.1754944e-38, %v1785_v43  ;;  %vm1784_vm4 = vcmp.eq.f32.partialorder %v1783_v45, 8.507059e+37 }
 0x99d   : > { %v2250_v40 = vpop.eup %2249 }
 0x99e   : > { %v1775_v41 = vmul.f32 %v2250_v40, %v1773_v39  ;;  %vm1780_vm0 = vweird.f32 %v2250_v40 }
 0x99f   : > { %vm1781_vm3 = vmor %vm1779_vm2, %vm1780_vm0 }
 0x9a0   : > { %v1776_v42 = vsub.f32 1.0, %v1775_v41 }
 0x9a2   : > { %v1777_v44 = vmul.f32 %v2250_v40, %v1776_v42 }
 0x9a4   : > { %v1778_v46 = vadd.f32 %v2250_v40, %v1777_v44 }
 0x9a6   : > { %v1782_v47 = vsel %vm1781_vm3, %v2250_v40, %v1778_v46 }
 0x9a7   : > { %v1787_v48 = vsel %vm1784_vm4, %v1786_v12, %v1782_v47 }
 0x9a8   : > { %v1788_v49 = vmul.f32 %v1787_v48, %v1753_v4 }
 0x9aa   : > { %1789 = vst.msk [vmem:[#allocation3] sm:$0x3] %vm1757_vm14, %v1788_v49 }
 0x9ab PF: > { %s2794_s17 = sld [smem:[#allocation7_spill]]  ;;  %s2323_s7 = smov [#allocation3]  }
 0x9ac   : > { %s2796_s28 = sld [smem:[#allocation16_spill]]  ;;  %s1798_s19 = sshll.u32 %s2323_s7, 4  ;;  %s1799_s19 = int_to_ptr.vmem [resolvable:$true] %s1798_s19 }
 0x9b1   : > { %s2795_s2 = sadd.s32 4294967295, %s2794_s17  }
 0x9b2   : > { %p2132_p7 = scmp.eq.s32.totalorder %s2795_s2, 1  ;;  %s1800_s25 = sshll.u32 %s2796_s28, 4  ;;  %s1801_s25 = int_to_ptr.hbm [resolvable:$true] %s1800_s25 }
 0x9b4   : > { %2129 = dma.vmem_to_hbm [thread:$0]  (%p2132_p7), %s1799_s19, 32, %s1801_s25, [#allocation4]  }
 0x9b5   : > { %2292 = dma.done.wait (%p2132_p7), [#allocation4], 32  }
 0x9b6   : > { %2294 = vsyncadd (%p2132_p7), [#allocation4], 4294967264 }
 0x9b7 PF: > { %s2797_s29 = sld [smem:[#allocation7_spill]] }
 0x9b8   : > { %s2798_s24 = sld [smem:[#allocation6_spill]] }
 0x9b9   : > { %s2799_s25 = sld [smem:[#allocation8_spill]] }
 0x9bd   : > { %s28_s26 = sadd.s32 1, %s2797_s29  }
 0x9be   : > { %p25_p8 = scmp.ge.s32.totalorder %s28_s26, 4  }
 0x9c0   :  { %27 = sbr.rel (!%p25_p8) target bundleno = 11 (0xb), region = 166 }
 0x9c5   :  { %1814 = vsyncpa [#allocation4], 1 }
 0x9c6   :  { %1816 = vsyncpa [#allocation4 + $0x1], 1 }

</bundles_post_ra>
